<compile_context>
chip_gen: v7x
topology: tpu7x:2x2x1
jax: 0.10.0
libtpu: 0.0.40
codegen_flags: <defaults>
</compile_context>

<pallas_src>
import jax
import jax.numpy as jnp
from jax import lax
from jax.experimental import pallas as pl
from jax.experimental.pallas import tpu as pltpu


def _atomic_nn_kernel(*refs):
    """Fused MLP on one batch tile.  refs = (x, w0, b0, ..., wL, bL, out).

    Hidden weights are (in, out); the final weight is (n_out, in) so the last
    contraction lands lane-dense as (n_out, batch_tile).  Biases are f32.
    """
    x_ref, out_ref = refs[0], refs[-1]
    wb = refs[1:-1]
    n_layers = len(wb) // 2

    h = x_ref[...].astype(jnp.float32)

    # Hidden layers: ReLU(h @ W + b).  MXU operands in the weight dtype
    # (bf16 on the fast path); accumulation + bias + ReLU in f32.
    for li in range(n_layers - 1):
        w = wb[2 * li][...]
        b = wb[2 * li + 1][...]
        h = jnp.dot(h.astype(w.dtype), w, preferred_element_type=jnp.float32) + b
        h = jnp.maximum(h, 0.0)

    # Final Linear, lane-dense: (n_out, K) x (batch, K) contracted on K -> (n_out, batch).
    w_last = wb[-2][...]          # (n_out, K)   -- PyTorch (out, in) layout
    b_last = wb[-1][...]          # (n_out, 1)
    out_row = lax.dot_general(
        w_last, h.astype(w_last.dtype),
        dimension_numbers=(((1,), (1,)), ((), ())),
        preferred_element_type=jnp.float32) + b_last
    out_ref[...] = out_row.astype(out_ref.dtype)


def _prepare_operands(params, use_bf16_matmul):
    """params: list of (W_T, b) with W_T (in, out), b (1, out) or (out,)."""
    wdtype = jnp.bfloat16 if use_bf16_matmul else jnp.float32
    flat = []
    last = len(params) - 1
    for li, (w, b) in enumerate(params):
        w = jnp.asarray(w)
        b = jnp.asarray(b)
        if li == last:
            flat.append(w.T.astype(wdtype))                    # (n_out, in)
            flat.append(b.reshape(-1, 1).astype(jnp.float32))  # (n_out, 1)
        else:
            flat.append(w.astype(wdtype))                      # (in, out)
            flat.append(b.reshape(1, -1).astype(jnp.float32))  # (1, out)
    return flat


# TODO(synk): for full ANI (one network per species), batch all species' atoms
# through a single pallas_call with scalar-prefetched per-row weight selection
# instead of issuing one small pallas_call per species.
def atomic_nn_forward(x, params, *, batch_tile=512, use_bf16_matmul=True):
    """AtomicNN forward.  x: (B, n_inputs) f32; params: [(W_T(in,out), b(1,out)), ...]."""
    B, n_in = x.shape
    n_out = params[-1][0].shape[-1]

    # Pad the batch to a tile multiple (zero rows are sliced off below).
    n_tiles = pl.cdiv(B, batch_tile)
    b_pad = n_tiles * batch_tile
    if b_pad != B:
        x = jnp.pad(x, ((0, b_pad - B), (0, 0)))

    flat = _prepare_operands(params, use_bf16_matmul)

    in_specs = [pl.BlockSpec((batch_tile, n_in), lambda i: (i, 0))]
    for op in flat:
        # Constant index_map -> block fetched once and kept resident in VMEM.
        in_specs.append(pl.BlockSpec(op.shape, lambda i: (0, 0)))
    out_specs = pl.BlockSpec((n_out, batch_tile), lambda i: (0, i))

    flops = 2 * b_pad * sum(int(w.shape[0]) * int(w.shape[1]) for w, _ in params)
    bytes_accessed = (int(x.size) * x.dtype.itemsize
                      + sum(int(a.size) * a.dtype.itemsize for a in flat)
                      + b_pad * n_out * 4)

    out_t = pl.pallas_call(
        _atomic_nn_kernel,
        out_shape=jax.ShapeDtypeStruct((n_out, b_pad), jnp.float32),
        grid_spec=pltpu.PrefetchScalarGridSpec(
            num_scalar_prefetch=0,
            grid=(b_pad // batch_tile,),
            in_specs=in_specs,
            out_specs=out_specs,
        ),
        compiler_params=pltpu.CompilerParams(
            dimension_semantics=("parallel",),  # shards batch tiles across TCs (v7x) when grid >= 2
        ),
        cost_estimate=pl.CostEstimate(
            flops=int(flops), transcendentals=0, bytes_accessed=int(bytes_accessed)),
    )(x, *flat)

    # (n_out, b_pad) lane-dense slab -> (B, n_out)
    return out_t.T[:B]


def init_atomic_nn_params(key, n_inputs, layers_sizes=None):
    """Deterministic init mimicking nn.Linear default: U(-1/sqrt(fan_in), +1/sqrt(fan_in))."""
    if layers_sizes is None:
        layers_sizes = [160, 128, 96, 1]
    sizes = [n_inputs] + list(layers_sizes)
    params = []
    for in_size, out_size in zip(sizes[:-1], sizes[1:]):
        key, kw, kb = jax.random.split(key, 3)
        bound = 1.0 / (in_size ** 0.5)
        # PyTorch stores weight as (out, in); we keep the transposed (in, out) layout.
        w_t = jax.random.uniform(kw, (in_size, out_size), jnp.float32, -bound, bound)
        b = jax.random.uniform(kb, (1, out_size), jnp.float32, -bound, bound)
        params.append((w_t, b))
    return params


def atomic_nn_reference(x, params):
    """Pure-JAX f32 reference of the PyTorch forward (for correctness check)."""
    h = x
    for i, (w, b) in enumerate(params):
        h = h @ w + b
        if i < len(params) - 1:
            h = jnp.maximum(h, 0.0)
    return h


if __name__ == "__main__":
    key = jax.random.PRNGKey(0)
    k_param, k_x = jax.random.split(key)

    n_inputs = 64          # AEV length (small, synthetic)
    batch = 16             # number of atoms (small demo; padded to one 512-row tile)
    layers_sizes = [160, 128, 96, 1]

    params = init_atomic_nn_params(k_param, n_inputs, layers_sizes)
    x = jax.random.normal(k_x, (batch, n_inputs), dtype=jnp.float32)
    ref = atomic_nn_reference(x, params)

    # Exact f32 path (matches PyTorch semantics bit-for-intent).
    out_f32 = jax.block_until_ready(
        atomic_nn_forward(x, params, use_bf16_matmul=False))
    assert out_f32.shape == (batch, 1)
    assert jnp.allclose(out_f32, ref, atol=1e-3, rtol=1e-3), "f32 mismatch vs reference"

    # bf16-MXU fast path (default): f32 accumulation, looser tolerance.
    out_bf16 = jax.block_until_ready(atomic_nn_forward(x, params))
    assert out_bf16.shape == (batch, 1)
    assert jnp.allclose(out_bf16, ref, atol=5e-2, rtol=5e-2), "bf16 mismatch vs reference"

    # Larger batch exercising padding (1000 -> 1024) and grid = 2 (megacore on v7x).
    k_x2, _ = jax.random.split(k_x)
    x2 = jax.random.normal(k_x2, (1000, n_inputs), dtype=jnp.float32)
    out2 = jax.block_until_ready(atomic_nn_forward(x2, params))
    ref2 = atomic_nn_reference(x2, params)
    assert out2.shape == (1000, 1)
    assert jnp.allclose(out2, ref2, atol=5e-2, rtol=5e-2), "padded-batch mismatch"

    print("KERNEL_OK")
</pallas_src>

<mosaic_0001>
module attributes {stable_mosaic.version = 11 : i64} {
  func.func @_atomic_nn_kernel(%arg0: i32, %arg1: memref<512x64xf32, #tpu.memory_space<vmem>>, %arg2: memref<64x160xf32, #tpu.memory_space<vmem>>, %arg3: memref<1x160xf32, #tpu.memory_space<vmem>>, %arg4: memref<160x128xf32, #tpu.memory_space<vmem>>, %arg5: memref<1x128xf32, #tpu.memory_space<vmem>>, %arg6: memref<128x96xf32, #tpu.memory_space<vmem>>, %arg7: memref<1x96xf32, #tpu.memory_space<vmem>>, %arg8: memref<1x96xf32, #tpu.memory_space<vmem>>, %arg9: memref<1x1xf32, #tpu.memory_space<vmem>>, %arg10: memref<1x512xf32, #tpu.memory_space<vmem>>) attributes {dimension_semantics = [#tpu.dimension_semantics<parallel>], iteration_bounds = array<i64: 1>, scalar_prefetch = 0 : i64, scratch_operands = 0 : i64, tpu.core_type = #tpu.core_type<tc>, window_params = [{transform_indices = @transform_0, window_bounds = array<i64: 512, 64>}, {pipeline_mode = #tpu.pipeline_mode<synchronous>, transform_indices = @transform_1, window_bounds = array<i64: 64, 160>}, {pipeline_mode = #tpu.pipeline_mode<synchronous>, transform_indices = @transform_2, window_bounds = array<i64: 1, 160>}, {pipeline_mode = #tpu.pipeline_mode<synchronous>, transform_indices = @transform_3, window_bounds = array<i64: 160, 128>}, {pipeline_mode = #tpu.pipeline_mode<synchronous>, transform_indices = @transform_4, window_bounds = array<i64: 1, 128>}, {pipeline_mode = #tpu.pipeline_mode<synchronous>, transform_indices = @transform_5, window_bounds = array<i64: 128, 96>}, {pipeline_mode = #tpu.pipeline_mode<synchronous>, transform_indices = @transform_6, window_bounds = array<i64: 1, 96>}, {pipeline_mode = #tpu.pipeline_mode<synchronous>, transform_indices = @transform_7, window_bounds = array<i64: 1, 96>}, {pipeline_mode = #tpu.pipeline_mode<synchronous>, transform_indices = @transform_8, window_bounds = array<i64: 1, 1>}, {transform_indices = @transform_9, window_bounds = array<i64: 1, 512>}]} {
    %c0 = arith.constant 0 : index
    %c0_0 = arith.constant 0 : index
    %0 = vector.load %arg1[%c0, %c0_0] : memref<512x64xf32, #tpu.memory_space<vmem>>, vector<512x64xf32>
    %c0_1 = arith.constant 0 : index
    %c0_2 = arith.constant 0 : index
    %1 = vector.load %arg2[%c0_1, %c0_2] : memref<64x160xf32, #tpu.memory_space<vmem>>, vector<64x160xf32>
    %c0_3 = arith.constant 0 : index
    %c0_4 = arith.constant 0 : index
    %2 = vector.load %arg3[%c0_3, %c0_4] : memref<1x160xf32, #tpu.memory_space<vmem>>, vector<1x160xf32>
    %cst = arith.constant dense<0.000000e+00> : vector<512x160xf32>
    %3 = tpu.matmul %0, %1, %cst {dimension_numbers = #tpu.dot_dimension_numbers<[1], [0], [0], [1], [0, 0, 1, 1], [], []>} : vector<512x64xf32>, vector<64x160xf32>, vector<512x160xf32> -> vector<512x160xf32>
    %4 = vector.broadcast %2 : vector<1x160xf32> to vector<512x160xf32>
    %5 = arith.addf %3, %4 : vector<512x160xf32>
    %cst_5 = arith.constant 0.000000e+00 : f32
    %6 = vector.broadcast %cst_5 : f32 to vector<512x160xf32>
    %7 = arith.maximumf %5, %6 : vector<512x160xf32>
    %c0_6 = arith.constant 0 : index
    %c0_7 = arith.constant 0 : index
    %8 = vector.load %arg4[%c0_6, %c0_7] : memref<160x128xf32, #tpu.memory_space<vmem>>, vector<160x128xf32>
    %c0_8 = arith.constant 0 : index
    %c0_9 = arith.constant 0 : index
    %9 = vector.load %arg5[%c0_8, %c0_9] : memref<1x128xf32, #tpu.memory_space<vmem>>, vector<1x128xf32>
    %cst_10 = arith.constant dense<0.000000e+00> : vector<512x128xf32>
    %10 = tpu.matmul %7, %8, %cst_10 {dimension_numbers = #tpu.dot_dimension_numbers<[1], [0], [0], [1], [0, 0, 1, 1], [], []>} : vector<512x160xf32>, vector<160x128xf32>, vector<512x128xf32> -> vector<512x128xf32>
    %11 = vector.broadcast %9 : vector<1x128xf32> to vector<512x128xf32>
    %12 = arith.addf %10, %11 : vector<512x128xf32>
    %cst_11 = arith.constant 0.000000e+00 : f32
    %13 = vector.broadcast %cst_11 : f32 to vector<512x128xf32>
    %14 = arith.maximumf %12, %13 : vector<512x128xf32>
    %c0_12 = arith.constant 0 : index
    %c0_13 = arith.constant 0 : index
    %15 = vector.load %arg6[%c0_12, %c0_13] : memref<128x96xf32, #tpu.memory_space<vmem>>, vector<128x96xf32>
    %c0_14 = arith.constant 0 : index
    %c0_15 = arith.constant 0 : index
    %16 = vector.load %arg7[%c0_14, %c0_15] : memref<1x96xf32, #tpu.memory_space<vmem>>, vector<1x96xf32>
    %cst_16 = arith.constant dense<0.000000e+00> : vector<512x96xf32>
    %17 = tpu.matmul %14, %15, %cst_16 {dimension_numbers = #tpu.dot_dimension_numbers<[1], [0], [0], [1], [0, 0, 1, 1], [], []>} : vector<512x128xf32>, vector<128x96xf32>, vector<512x96xf32> -> vector<512x96xf32>
    %18 = vector.broadcast %16 : vector<1x96xf32> to vector<512x96xf32>
    %19 = arith.addf %17, %18 : vector<512x96xf32>
    %cst_17 = arith.constant 0.000000e+00 : f32
    %20 = vector.broadcast %cst_17 : f32 to vector<512x96xf32>
    %21 = arith.maximumf %19, %20 : vector<512x96xf32>
    %c0_18 = arith.constant 0 : index
    %c0_19 = arith.constant 0 : index
    %22 = vector.load %arg8[%c0_18, %c0_19] : memref<1x96xf32, #tpu.memory_space<vmem>>, vector<1x96xf32>
    %c0_20 = arith.constant 0 : index
    %c0_21 = arith.constant 0 : index
    %23 = vector.load %arg9[%c0_20, %c0_21] : memref<1x1xf32, #tpu.memory_space<vmem>>, vector<1x1xf32>
    %cst_22 = arith.constant dense<0.000000e+00> : vector<1x512xf32>
    %24 = tpu.matmul %22, %21, %cst_22 {dimension_numbers = #tpu.dot_dimension_numbers<[1], [1], [0], [0], [0, 0, 1, 0], [], []>} : vector<1x96xf32>, vector<512x96xf32>, vector<1x512xf32> -> vector<1x512xf32>
    %25 = vector.broadcast %23 : vector<1x1xf32> to vector<1x512xf32>
    %26 = arith.addf %24, %25 : vector<1x512xf32>
    %c0_23 = arith.constant 0 : index
    %c0_24 = arith.constant 0 : index
    %27 = vector.load %arg10[%c0_23, %c0_24] : memref<1x512xf32, #tpu.memory_space<vmem>>, vector<1x512xf32>
    tpu.vector_store %arg10[%c0_23, %c0_24], %26 {strides = array<i32>} : memref<1x512xf32, #tpu.memory_space<vmem>>, vector<1x512xf32>,
    return
  }
  func.func @transform_0(%arg0: i32) -> (i32, i32) {
    %c0_i32 = arith.constant 0 : i32
    %c0_i32_0 = arith.constant 0 : i32
    return %arg0, %c0_i32 : i32, i32
  }
  func.func @transform_1(%arg0: i32) -> (i32, i32) {
    %c0_i32 = arith.constant 0 : i32
    %c0_i32_0 = arith.constant 0 : i32
    %c0_i32_1 = arith.constant 0 : i32
    return %c0_i32, %c0_i32_0 : i32, i32
  }
  func.func @transform_2(%arg0: i32) -> (i32, i32) {
    %c0_i32 = arith.constant 0 : i32
    %c0_i32_0 = arith.constant 0 : i32
    %c0_i32_1 = arith.constant 0 : i32
    return %c0_i32, %c0_i32_0 : i32, i32
  }
  func.func @transform_3(%arg0: i32) -> (i32, i32) {
    %c0_i32 = arith.constant 0 : i32
    %c0_i32_0 = arith.constant 0 : i32
    %c0_i32_1 = arith.constant 0 : i32
    return %c0_i32, %c0_i32_0 : i32, i32
  }
  func.func @transform_4(%arg0: i32) -> (i32, i32) {
    %c0_i32 = arith.constant 0 : i32
    %c0_i32_0 = arith.constant 0 : i32
    %c0_i32_1 = arith.constant 0 : i32
    return %c0_i32, %c0_i32_0 : i32, i32
  }
  func.func @transform_5(%arg0: i32) -> (i32, i32) {
    %c0_i32 = arith.constant 0 : i32
    %c0_i32_0 = arith.constant 0 : i32
    %c0_i32_1 = arith.constant 0 : i32
    return %c0_i32, %c0_i32_0 : i32, i32
  }
  func.func @transform_6(%arg0: i32) -> (i32, i32) {
    %c0_i32 = arith.constant 0 : i32
    %c0_i32_0 = arith.constant 0 : i32
    %c0_i32_1 = arith.constant 0 : i32
    return %c0_i32, %c0_i32_0 : i32, i32
  }
  func.func @transform_7(%arg0: i32) -> (i32, i32) {
    %c0_i32 = arith.constant 0 : i32
    %c0_i32_0 = arith.constant 0 : i32
    %c0_i32_1 = arith.constant 0 : i32
    return %c0_i32, %c0_i32_0 : i32, i32
  }
  func.func @transform_8(%arg0: i32) -> (i32, i32) {
    %c0_i32 = arith.constant 0 : i32
    %c0_i32_0 = arith.constant 0 : i32
    %c0_i32_1 = arith.constant 0 : i32
    return %c0_i32, %c0_i32_0 : i32, i32
  }
  func.func @transform_9(%arg0: i32) -> (i32, i32) {
    %c0_i32 = arith.constant 0 : i32
    %c0_i32_0 = arith.constant 0 : i32
    return %c0_i32, %arg0 : i32, i32
  }
}

</mosaic_0001>

<bundles_post_ra>
// kernel: tpu_custom_call.1
= control target key start
LH: loop header
LB: loop body
LE: loop exit
PB: predicated region body
PF: predicated region fallthrough
CT: control target
= control target key end

     0   :  { %s4146_s0 = inlined_call_operand.vmem [shape: f32[512,64], index: 0, kind: input, shape index: {}]   ;;  %s4147_s1 = inlined_call_operand.vmem [shape: f32[64,160], index: 1, kind: input, shape index: {}]   ;;  %s4148_s2 = inlined_call_operand.vmem [shape: f32[1,160], index: 2, kind: input, shape index: {}]   ;;  %s4149_s3 = inlined_call_operand.vmem [shape: f32[160,128], index: 3, kind: input, shape index: {}]   ;;  %s4150_s4 = inlined_call_operand.vmem [shape: f32[1,128], index: 4, kind: input, shape index: {}]   ;;  %s4151_s5 = inlined_call_operand.vmem [shape: f32[128,96], index: 5, kind: input, shape index: {}]   ;;  %s4152_s6 = inlined_call_operand.vmem [shape: f32[1,96], index: 6, kind: input, shape index: {}]   ;;  %s4153_s7 = inlined_call_operand.vmem [shape: f32[1,96], index: 7, kind: input, shape index: {}]   ;;  %s4154_s8 = inlined_call_operand.<no memory space> [shape: f32[1,1], index: 8, kind: input, shape index: {}]   ;;  %s4155_s9 = inlined_call_operand.hbm [shape: f32[1,512], index: 9, kind: output, shape index: {}]  }
   0x1   :  { %v14_v0 = vstv %s4154_s8 }
   0x2   :  { %15 = vst [vmem:[#allocation2] sm:$0x1] %v14_v0 }
   0x3   :  { %v100_v1 = vld [vmem:[%s4147_s1 + $0x8] sm:$0xff]  ;;  %v102_v2 = vld [vmem:[%s4147_s1 + $0x18] sm:$0xff]  ;;  %v99_v3 = vld [vmem:[%s4147_s1] sm:$0xff]  ;;  %v3111_v8 = vmov 0.0   ;;  %vm127_vm0 = vcmask 523264   ;;  %v3112_v27 = vmov 0.0|0.0  }
   0x4   :  { %v2907_v4 = vpack.c.bf16 %v102_v2, %v100_v1  ;;  %v101_v5 = vld [vmem:[%s4147_s1 + $0x10] sm:$0xff]  ;;  %v104_v6 = vld [vmem:[%s4147_s1 + $0x28] sm:$0xff]  ;;  %v106_v7 = vld [vmem:[%s4147_s1 + $0x38] sm:$0xff]  ;;  %384 = vmatprep.mubr.f32.mxu0 %v3111_v8  ;;  %2923 = vmatprep.subr.bf16.mxu1 %v3112_v27 }
   0x5   :  { %v2909_v9 = vpack.c.bf16 %v101_v5, %v99_v3  ;;  %v2911_v10 = vpack.c.bf16 %v106_v7, %v104_v6  ;;  %v103_v11 = vld [vmem:[%s4147_s1 + $0x20] sm:$0xff]  ;;  %v105_v12 = vld [vmem:[%s4147_s1 + $0x30] sm:$0xff]  ;;  %v108_v13 = vld [vmem:[%s4147_s1 + $0x48] sm:$0xff] }
   0x6   :  { %2908 = vmatprep.subr.bf16.mxu0 %v2907_v4  ;;  %v110_v14 = vld [vmem:[%s4147_s1 + $0x58] sm:$0xff]  ;;  %v2913_v15 = vpack.c.bf16 %v105_v12, %v103_v11  ;;  %v107_v17 = vld [vmem:[%s4147_s1 + $0x40] sm:$0xff]  ;;  %v109_v18 = vld [vmem:[%s4147_s1 + $0x50] sm:$0xff] }
   0x7   :  { %2910 = vmatpush1.bf16.msra.mxu0 %v2909_v9  ;;  %v2915_v16 = vpack.c.bf16 %v110_v14, %v108_v13  ;;  %v112_v19 = vld [vmem:[%s4147_s1 + $0x68] sm:$0xff]  ;;  %v114_v20 = vld [vmem:[%s4147_s1 + $0x78] sm:$0xff]  ;;  %v2917_v21 = vpack.c.bf16 %v109_v18, %v107_v17  ;;  %v111_v23 = vld [vmem:[%s4147_s1 + $0x60] sm:$0xff] }
   0x8   :  { %2912 = vmatprep.subr.bf16.mxu0 %v2911_v10  ;;  %v2919_v22 = vpack.c.bf16 %v114_v20, %v112_v19  ;;  %v113_v24 = vld [vmem:[%s4147_s1 + $0x70] sm:$0xff]  ;;  %v35_v26 = vld [vmem:[%s4146_s0] sm:$0xff]  ;;  %v898_v29 = vld [vmem:[%s4149_s3 + $0x8] sm:$0xff] }
   0x9   :  { %v2921_v25 = vpack.c.bf16 %v113_v24, %v111_v23  ;;  %v897_v28 = vld [vmem:[%s4149_s3] sm:$0xff]  ;;  %v899_v30 = vld [vmem:[%s4149_s3 + $0x10] sm:$0xff]  ;;  %v900_v32 = vld [vmem:[%s4149_s3 + $0x18] sm:$0xff] }
   0xa   :  { %v2924_v31 = vpack.c.bf16 %v898_v29, %v897_v28 }
   0xb   :  { %2914 = vmatpush1.bf16.msra.mxu0 %v2913_v15 }
   0xc   :  { %2916 = vmatprep.subr.bf16.mxu0 %v2915_v16 }
   0xf   :  { %2918 = vmatpush1.bf16.msra.mxu0 %v2917_v21 }
  0x10   :  { %2920 = vmatprep.subr.bf16.mxu0 %v2919_v22 }
  0x13   :  { %2922 = vmatpush1.bf16.msra.mxu0 %v2921_v25 }
  0x14   :  { %16 = vsyncpa [#allocation4], 0  ;;  %2925 = vmatpush1.bf16.msra.mxu1 %v2924_v31  ;;  %v2927_v33 = vpack.c.bf16 %v900_v32, %v899_v30  ;;  %v36_v34 = vld [vmem:[%s4146_s0 + $0x8] sm:$0xff]  ;;  %v901_v35 = vld [vmem:[%s4149_s3 + $0x20] sm:$0xff]  ;;  %vm924_vm1 = vcmask 261120   ;;  %vm2049_vm2 = vcmask 785408  }
  0x15   :  { %2926 = vmatprep.subr.bf16.mxu1 %v3112_v27  ;;  %v902_v36 = vld [vmem:[%s4149_s3 + $0x28] sm:$0xff]  ;;  %v37_v38 = vld [vmem:[%s4146_s0 + $0x10] sm:$0xff]  ;;  %v904_v40 = vld [vmem:[%s4149_s3 + $0x38] sm:$0xff] }
  0x16   :  { %2435 = vmatmul.mubr.msk.f32.vlgmr.msra.gmra.mrb[0].mxu0 %vm127_vm0, %v35_v26  ;;  %v2930_v37 = vpack.c.bf16 %v902_v36, %v901_v35  ;;  %v903_v39 = vld [vmem:[%s4149_s3 + $0x30] sm:$0xff]  ;;  %v38_v42 = vld [vmem:[%s4146_s0 + $0x18] sm:$0xff]  ;;  %v905_v43 = vld [vmem:[%s4149_s3 + $0x40] sm:$0xff] }
  0x17   :  { %390 = vmatprep.mubr.f32.mxu0 %v3111_v8  ;;  %v2933_v41 = vpack.c.bf16 %v904_v40, %v903_v39  ;;  %v906_v44 = vld [vmem:[%s4149_s3 + $0x48] sm:$0xff]  ;;  %v39_v46 = vld [vmem:[%s4146_s0 + $0x20] sm:$0xff]  ;;  %v907_v47 = vld [vmem:[%s4149_s3 + $0x50] sm:$0xff] }
  0x18   :  { %2928 = vmatpush1.bf16.msra.mxu1 %v2927_v33  ;;  %v2936_v45 = vpack.c.bf16 %v906_v44, %v905_v43  ;;  %v908_v48 = vld [vmem:[%s4149_s3 + $0x58] sm:$0xff]  ;;  %v40_v50 = vld [vmem:[%s4146_s0 + $0x28] sm:$0xff]  ;;  %v909_v51 = vld [vmem:[%s4149_s3 + $0x60] sm:$0xff]  ;;  %v117_v44 = vlaneseq }
  0x19   :  { %2929 = vmatprep.subr.bf16.mxu1 %v3112_v27  ;;  %v2939_v49 = vpack.c.bf16 %v908_v48, %v907_v47  ;;  %v910_v52 = vld [vmem:[%s4149_s3 + $0x68] sm:$0xff]  ;;  %v41_v54 = vld [vmem:[%s4146_s0 + $0x30] sm:$0xff]  ;;  %v912_v56 = vld [vmem:[%s4149_s3 + $0x78] sm:$0xff] }
  0x1a   :  { %2436 = vmatmul.mubr.msk.f32.gmra.mrb[2].mxu0 %vm127_vm0, %v36_v34  ;;  %v2942_v53 = vpack.c.bf16 %v910_v52, %v909_v51  ;;  %v911_v55 = vld [vmem:[%s4149_s3 + $0x70] sm:$0xff]  ;;  %v42_v58 = vld [vmem:[%s4146_s0 + $0x38] sm:$0xff]  ;;  %v43_v59 = vld [vmem:[%s4146_s0 + $0x40] sm:$0xff]  ;;  %vm2418_vm4 = vcmp.lt.s32.totalorder %v117_v44, 512 }
  0x1b   :  { %396 = vmatprep.mubr.f32.mxu0 %v3111_v8  ;;  %v2945_v57 = vpack.c.bf16 %v912_v56, %v911_v55  ;;  %v44_v60 = vld [vmem:[%s4146_s0 + $0x48] sm:$0xff]  ;;  %v45_v61 = vld [vmem:[%s4146_s0 + $0x50] sm:$0xff]  ;;  %v46_v62 = vld [vmem:[%s4146_s0 + $0x58] sm:$0xff] }
  0x1c   :  { %2931 = vmatpush1.bf16.msra.mxu1 %v2930_v37  ;;  %v47_v63 = vld [vmem:[%s4146_s0 + $0x60] sm:$0xff]  ;;  %v48_v0 = vld [vmem:[%s4146_s0 + $0x68] sm:$0xff]  ;;  %v49_v1 = vld [vmem:[%s4146_s0 + $0x70] sm:$0xff] }
  0x1d   :  { %2932 = vmatprep.subr.bf16.mxu1 %v3112_v27  ;;  %v50_v2 = vld [vmem:[%s4146_s0 + $0x78] sm:$0xff]  ;;  %v51_v3 = vld [vmem:[%s4146_s0 + $0x80] sm:$0xff]  ;;  %v52_v4 = vld [vmem:[%s4146_s0 + $0x88] sm:$0xff] }
  0x1e   :  { %2437 = vmatmul.mubr.msk.f32.gmra.mrb[4].mxu0 %vm127_vm0, %v37_v38  ;;  %v53_v5 = vld [vmem:[%s4146_s0 + $0x90] sm:$0xff]  ;;  %v54_v6 = vld [vmem:[%s4146_s0 + $0x98] sm:$0xff]  ;;  %v55_v7 = vld [vmem:[%s4146_s0 + $0xa0] sm:$0xff] }
  0x1f   :  { %402 = vmatprep.mubr.f32.mxu0 %v3111_v8  ;;  %v913_v9 = vld [vmem:[%s4149_s3 + $0x80] sm:$0xff]  ;;  %v914_v10 = vld [vmem:[%s4149_s3 + $0x88] sm:$0xff]  ;;  %v915_v13 = vld [vmem:[%s4149_s3 + $0x90] sm:$0xff] }
  0x20   :  { %2934 = vmatpush1.bf16.msra.mxu1 %v2933_v41  ;;  %v56_v11 = vld [vmem:[%s4146_s0 + $0xa8] sm:$0xff]  ;;  %v2948_v12 = vpack.c.bf16 %v914_v10, %v913_v9  ;;  %v916_v14 = vld [vmem:[%s4149_s3 + $0x98] sm:$0xff]  ;;  %v57_v15 = vld [vmem:[%s4146_s0 + $0xb0] sm:$0xff] }
  0x21   :  { %2935 = vmatprep.subr.bf16.mxu1 %v3112_v27  ;;  %v2951_v16 = vpack.c.bf16 %v916_v14, %v915_v13  ;;  %v58_v17 = vld [vmem:[%s4146_s0 + $0xb8] sm:$0xff]  ;;  %v59_v18 = vld [vmem:[%s4146_s0 + $0xc0] sm:$0xff]  ;;  %v60_v19 = vld [vmem:[%s4146_s0 + $0xc8] sm:$0xff] }
  0x22   :  { %2438 = vmatmul.mubr.msk.f32.gmra.mrb[6].mxu0 %vm127_vm0, %v38_v42  ;;  %v61_v20 = vld [vmem:[%s4146_s0 + $0xd0] sm:$0xff]  ;;  %v62_v21 = vld [vmem:[%s4146_s0 + $0xd8] sm:$0xff]  ;;  %v63_v22 = vld [vmem:[%s4146_s0 + $0xe0] sm:$0xff] }
  0x23   :  { %408 = vmatprep.mubr.f32.mxu0 %v3111_v8  ;;  %v64_v23 = vld [vmem:[%s4146_s0 + $0xe8] sm:$0xff]  ;;  %v65_v24 = vld [vmem:[%s4146_s0 + $0xf0] sm:$0xff]  ;;  %v66_v25 = vld [vmem:[%s4146_s0 + $0xf8] sm:$0xff] }
  0x24   :  { %2937 = vmatpush1.bf16.msra.mxu1 %v2936_v45  ;;  %v67_v26 = vld [vmem:[%s4146_s0 + $0x100] sm:$0xff]  ;;  %v69_v28 = vld [vmem:[%s4146_s0 + $0x110] sm:$0xff]  ;;  %v70_v29 = vld [vmem:[%s4146_s0 + $0x118] sm:$0xff] }
  0x25   :  { %2938 = vmatprep.subr.bf16.mxu1 %v3112_v27  ;;  %v71_v30 = vld [vmem:[%s4146_s0 + $0x120] sm:$0xff]  ;;  %v72_v31 = vld [vmem:[%s4146_s0 + $0x128] sm:$0xff]  ;;  %v73_v32 = vld [vmem:[%s4146_s0 + $0x130] sm:$0xff] }
  0x26   :  { %2439 = vmatmul.mubr.msk.f32.gmra.mrb[8].mxu0 %vm127_vm0, %v39_v46  ;;  %v74_v33 = vld [vmem:[%s4146_s0 + $0x138] sm:$0xff]  ;;  %v75_v34 = vld [vmem:[%s4146_s0 + $0x140] sm:$0xff]  ;;  %v76_v35 = vld [vmem:[%s4146_s0 + $0x148] sm:$0xff]  ;;  %v3542_v46 = vshrl.u32 %v117_v44, 7 }
  0x27   :  { %414 = vmatprep.mubr.f32.mxu0 %v3111_v8  ;;  %v77_v36 = vld [vmem:[%s4146_s0 + $0x150] sm:$0xff]  ;;  %v78_v37 = vld [vmem:[%s4146_s0 + $0x158] sm:$0xff]  ;;  %v79_v38 = vld [vmem:[%s4146_s0 + $0x160] sm:$0xff] }
  0x28   :  { %2940 = vmatpush1.bf16.msra.mxu1 %v2939_v49  ;;  %v80_v39 = vld [vmem:[%s4146_s0 + $0x168] sm:$0xff]  ;;  %v81_v40 = vld [vmem:[%s4146_s0 + $0x170] sm:$0xff]  ;;  %v82_v41 = vld [vmem:[%s4146_s0 + $0x178] sm:$0xff]  ;;  %v119_v48 = vsub.s32 0, %v3542_v46 }
  0x29   :  { %2941 = vmatprep.subr.bf16.mxu1 %v3112_v27  ;;  %v83_v42 = vld [vmem:[%s4146_s0 + $0x180] sm:$0xff]  ;;  %v84_v43 = vld [vmem:[%s4146_s0 + $0x188] sm:$0xff]  ;;  %v85_v45 = vld [vmem:[%s4146_s0 + $0x190] sm:$0xff] }
  0x2a   :  { %2440 = vmatmul.mubr.msk.f32.gmra.mrb[10].mxu0 %vm127_vm0, %v40_v50  ;;  %v86_v47 = vld [vmem:[%s4146_s0 + $0x198] sm:$0xff]  ;;  %v115_v49 = vld [vmem:[%s4148_s2] sm:$0x3]  ;;  %v123_v50 = vsub.s32 1, %v3542_v46  ;;  %vm3971_vm3 = vmpackc.low %vm2049_vm2, %vm2049_vm2 }
  0x2b   :  { %420 = vmatprep.mubr.f32.mxu0 %v3111_v8  ;;  %v87_v51 = vld [vmem:[%s4146_s0 + $0x1a0] sm:$0xff]  ;;  %v3561_v52 = vrot.slane %v115_v49, %v119_v48 }
  0x2c   :  { %2943 = vmatpush1.bf16.msra.mxu1 %v2942_v53  ;;  %v3564_v53 = vrot.slane %v115_v49, %v123_v50  ;;  %v91_v13 = vld [vmem:[%s4146_s0 + $0x1c0] sm:$0xff]  ;;  %v1575_v50 = vld [vmem:[%s4151_s5 + $0x48] sm:$0xff] }
  0x2d   :  { %2944 = vmatprep.subr.bf16.mxu1 %v3112_v27  ;;  %v1574_v49 = vld [vmem:[%s4151_s5 + $0x40] sm:$0xff] }
  0x2e   :  { %2441 = vmatmul.mubr.msk.f32.gmra.mrb[12].mxu0 %vm127_vm0, %v41_v54  ;;  %v88_v54 = vld [vmem:[%s4146_s0 + $0x1a8] sm:$0xff] }
  0x2f   :  { %426 = vmatprep.mubr.f32.mxu0 %v3111_v8 }
  0x30   :  { %2946 = vmatpush1.bf16.msra.mxu1 %v2945_v57 }
  0x31   :  { %2947 = vmatprep.subr.bf16.mxu1 %v3112_v27 }
  0x32   :  { %2442 = vmatmul.mubr.msk.f32.gmra.mrb[14].mxu0 %vm127_vm0, %v42_v58 }
  0x33   :  { %432 = vmatprep.mubr.f32.mxu0 %v3111_v8 }
  0x34   :  { %2949 = vmatpush1.bf16.msra.mxu1 %v2948_v12 }
  0x35   :  { %2950 = vmatprep.subr.bf16.mxu1 %v3112_v27  ;;  %v68_v27 = vld [vmem:[%s4146_s0 + $0x108] sm:$0xff] }
  0x36   :  { %2443 = vmatmul.mubr.msk.f32.gmra.mrb[16].mxu0 %vm127_vm0, %v43_v59  ;;  %v89_v59 = vld [vmem:[%s4146_s0 + $0x1b0] sm:$0xff] }
  0x37   :  { %438 = vmatprep.mubr.f32.mxu0 %v3111_v8 }
  0x38   :  { %2952 = vmatpush1.bf16.msra.mxu1 %v2951_v16  ;;  %v1568_v16 = vld [vmem:[%s4151_s5 + $0x10] sm:$0xff] }
  0x3a   :  { %2444 = vmatmul.mubr.msk.f32.gmra.mrb[18].mxu0 %vm127_vm0, %v44_v60 }
  0x3b   :  { %444 = vmatprep.mubr.f32.mxu0 %v3111_v8 }
  0x3e   :  { %2445 = vmatmul.mubr.msk.f32.gmra.mrb[20].mxu0 %vm127_vm0, %v45_v61 }
  0x3f   :  { %450 = vmatprep.mubr.f32.mxu0 %v3111_v8 }
  0x42   :  { %2446 = vmatmul.mubr.msk.f32.gmra.mrb[22].mxu0 %vm127_vm0, %v46_v62 }
  0x43   :  { %456 = vmatprep.mubr.f32.mxu0 %v3111_v8 }
  0x46   :  { %2447 = vmatmul.mubr.msk.f32.gmra.mrb[24].mxu0 %vm127_vm0, %v47_v63 }
  0x47   :  { %462 = vmatprep.mubr.f32.mxu0 %v3111_v8 }
  0x4a   :  { %2448 = vmatmul.mubr.msk.f32.gmra.mrb[26].mxu0 %vm127_vm0, %v48_v0 }
  0x4b   :  { %468 = vmatprep.mubr.f32.mxu0 %v3111_v8 }
  0x4e   :  { %2449 = vmatmul.mubr.msk.f32.gmra.mrb[28].mxu0 %vm127_vm0, %v49_v1 }
  0x4f   :  { %474 = vmatprep.mubr.f32.mxu0 %v3111_v8 }
  0x52   :  { %2450 = vmatmul.mubr.msk.f32.gmra.mrb[30].mxu0 %vm127_vm0, %v50_v2  ;;  %v90_v2 = vld [vmem:[%s4146_s0 + $0x1b8] sm:$0xff] }
  0x53   :  { %480 = vmatprep.mubr.f32.mxu0 %v3111_v8 }
  0x56   :  { %2451 = vmatmul.mubr.msk.f32.gmra.mrb[32].mxu0 %vm127_vm0, %v51_v3 }
  0x57   :  { %486 = vmatprep.mubr.f32.mxu0 %v3111_v8 }
  0x5a   :  { %2452 = vmatmul.mubr.msk.f32.gmra.mrb[34].mxu0 %vm127_vm0, %v52_v4 }
  0x5b   :  { %492 = vmatprep.mubr.f32.mxu0 %v3111_v8 }
  0x5e   :  { %2453 = vmatmul.mubr.msk.f32.gmra.mrb[36].mxu0 %vm127_vm0, %v53_v5  ;;  %v1566_v5 = vld [vmem:[%s4151_s5] sm:$0xff] }
  0x5f   :  { %498 = vmatprep.mubr.f32.mxu0 %v3111_v8 }
  0x62   :  { %2454 = vmatmul.mubr.msk.f32.gmra.mrb[38].mxu0 %vm127_vm0, %v54_v6  ;;  %v1567_v6 = vld [vmem:[%s4151_s5 + $0x8] sm:$0xff] }
  0x63   :  { %504 = vmatprep.mubr.f32.mxu0 %v3111_v8 }
  0x66   :  { %2455 = vmatmul.mubr.msk.f32.gmra.mrb[40].mxu0 %vm127_vm0, %v55_v7 }
  0x67   :  { %510 = vmatprep.mubr.f32.mxu0 %v3111_v8 }
  0x6a   :  { %2456 = vmatmul.mubr.msk.f32.gmra.mrb[42].mxu0 %vm127_vm0, %v56_v11  ;;  %v2953_v11 = vpack.c.bf16 %v1567_v6, %v1566_v5 }
  0x6b   :  { %516 = vmatprep.mubr.f32.mxu0 %v3111_v8 }
  0x6c   :  { %2954 = vmatprep.subr.bf16.mxu0 %v2953_v11 }
  0x6d   :  { %2956 = vmatpush3.bf16.msra.mxu0 %v2953_v11 }
  0x6e   :  { %2457 = vmatmul.mubr.msk.f32.gmra.mrb[44].mxu0 %vm127_vm0, %v57_v15 }
  0x6f   :  { %522 = vmatprep.mubr.f32.mxu0 %v3111_v8 }
  0x72   :  { %2458 = vmatmul.mubr.msk.f32.gmra.mrb[46].mxu0 %vm127_vm0, %v58_v17  ;;  %v1569_v17 = vld [vmem:[%s4151_s5 + $0x18] sm:$0xff] }
  0x73   :  { %528 = vmatprep.mubr.f32.mxu0 %v3111_v8 }
  0x76   :  { %2459 = vmatmul.mubr.msk.f32.gmra.mrb[48].mxu0 %vm127_vm0, %v59_v18 }
  0x77   :  { %534 = vmatprep.mubr.f32.mxu0 %v3111_v8 }
  0x7a   :  { %2460 = vmatmul.mubr.msk.f32.gmra.mrb[50].mxu0 %vm127_vm0, %v60_v19 }
  0x7b   :  { %540 = vmatprep.mubr.f32.mxu0 %v3111_v8 }
  0x7e   :  { %2461 = vmatmul.mubr.msk.f32.gmra.mrb[52].mxu0 %vm127_vm0, %v61_v20 }
  0x7f   :  { %546 = vmatprep.mubr.f32.mxu0 %v3111_v8 }
  0x82   :  { %2462 = vmatmul.mubr.msk.f32.gmra.mrb[54].mxu0 %vm127_vm0, %v62_v21  ;;  %v2957_v21 = vpack.c.bf16 %v1569_v17, %v1568_v16 }
  0x83   :  { %552 = vmatprep.mubr.f32.mxu0 %v3111_v8 }
  0x84   :  { %2958 = vmatprep.subr.bf16.mxu0 %v2957_v21 }
  0x85   :  { %2960 = vmatpush3.bf16.msra.mxu0 %v2957_v21 }
  0x86   :  { %2463 = vmatmul.mubr.msk.f32.gmra.mrb[56].mxu0 %vm127_vm0, %v63_v22 }
  0x87   :  { %558 = vmatprep.mubr.f32.mxu0 %v3111_v8 }
  0x8a   :  { %2464 = vmatmul.mubr.msk.f32.gmra.mrb[58].mxu0 %vm127_vm0, %v64_v23  ;;  %v92_v23 = vld [vmem:[%s4146_s0 + $0x1c8] sm:$0xff] }
  0x8b   :  { %564 = vmatprep.mubr.f32.mxu0 %v3111_v8 }
  0x8e   :  { %2465 = vmatmul.mubr.msk.f32.gmra.mrb[60].mxu0 %vm127_vm0, %v65_v24 }
  0x8f   :  { %570 = vmatprep.mubr.f32.mxu0 %v3111_v8 }
  0x92   :  { %2466 = vmatmul.mubr.msk.f32.gmra.mrb[62].mxu0 %vm127_vm0, %v66_v25 }
  0x93   :  { %576 = vmatprep.mubr.f32.mxu0 %v3111_v8 }
  0x96   :  { %2467 = vmatmul.mubr.msk.f32.gmra.mrb[64].mxu0 %vm127_vm0, %v67_v26  ;;  %v1570_v26 = vld [vmem:[%s4151_s5 + $0x20] sm:$0xff] }
  0x97   :  { %582 = vmatprep.mubr.f32.mxu0 %v3111_v8 }
  0x9a   :  { %2468 = vmatmul.mubr.msk.f32.gmra.mrb[66].mxu0 %vm127_vm0, %v68_v27  ;;  %v1571_v27 = vld [vmem:[%s4151_s5 + $0x28] sm:$0xff] }
  0x9b   :  { %588 = vmatprep.mubr.f32.mxu0 %v3111_v8 }
  0x9e   :  { %2469 = vmatmul.mubr.msk.f32.gmra.mrb[68].mxu0 %vm127_vm0, %v69_v28 }
  0x9f   :  { %594 = vmatprep.mubr.f32.mxu0 %v3111_v8 }
  0xa2   :  { %2470 = vmatmul.mubr.msk.f32.gmra.mrb[70].mxu0 %vm127_vm0, %v70_v29 }
  0xa3   :  { %600 = vmatprep.mubr.f32.mxu0 %v3111_v8 }
  0xa6   :  { %2471 = vmatmul.mubr.msk.f32.gmra.mrb[72].mxu0 %vm127_vm0, %v71_v30 }
  0xa7   :  { %606 = vmatprep.mubr.f32.mxu0 %v3111_v8 }
  0xaa   :  { %2472 = vmatmul.mubr.msk.f32.gmra.mrb[74].mxu0 %vm127_vm0, %v72_v31  ;;  %v2961_v31 = vpack.c.bf16 %v1571_v27, %v1570_v26 }
  0xab   :  { %612 = vmatprep.mubr.f32.mxu0 %v3111_v8 }
  0xac   :  { %2962 = vmatprep.subr.bf16.mxu0 %v2961_v31 }
  0xad   :  { %2964 = vmatpush3.bf16.msra.mxu0 %v2961_v31 }
  0xae   :  { %2473 = vmatmul.mubr.msk.f32.gmra.mrb[76].mxu0 %vm127_vm0, %v73_v32 }
  0xaf   :  { %618 = vmatprep.mubr.f32.mxu0 %v3111_v8 }
  0xb2   :  { %2474 = vmatmul.mubr.msk.f32.gmra.mrb[78].mxu0 %vm127_vm0, %v74_v33  ;;  %v93_v33 = vld [vmem:[%s4146_s0 + $0x1d0] sm:$0xff] }
  0xb3   :  { %624 = vmatprep.mubr.f32.mxu0 %v3111_v8 }
  0xb6   :  { %2475 = vmatmul.mubr.msk.f32.gmra.mrb[80].mxu0 %vm127_vm0, %v75_v34 }
  0xb7   :  { %630 = vmatprep.mubr.f32.mxu0 %v3111_v8 }
  0xba   :  { %2476 = vmatmul.mubr.msk.f32.gmra.mrb[82].mxu0 %vm127_vm0, %v76_v35 }
  0xbb   :  { %636 = vmatprep.mubr.f32.mxu0 %v3111_v8 }
  0xbe   :  { %2477 = vmatmul.mubr.msk.f32.gmra.mrb[84].mxu0 %vm127_vm0, %v77_v36  ;;  %v1572_v36 = vld [vmem:[%s4151_s5 + $0x30] sm:$0xff] }
  0xbf   :  { %642 = vmatprep.mubr.f32.mxu0 %v3111_v8 }
  0xc2   :  { %2478 = vmatmul.mubr.msk.f32.gmra.mrb[86].mxu0 %vm127_vm0, %v78_v37  ;;  %v1573_v37 = vld [vmem:[%s4151_s5 + $0x38] sm:$0xff] }
  0xc3   :  { %648 = vmatprep.mubr.f32.mxu0 %v3111_v8 }
  0xc6   :  { %2479 = vmatmul.mubr.msk.f32.gmra.mrb[88].mxu0 %vm127_vm0, %v79_v38 }
  0xc7   :  { %654 = vmatprep.mubr.f32.mxu0 %v3111_v8 }
  0xca   :  { %2480 = vmatmul.mubr.msk.f32.gmra.mrb[90].mxu0 %vm127_vm0, %v80_v39 }
  0xcb   :  { %660 = vmatprep.mubr.f32.mxu0 %v3111_v8 }
  0xce   :  { %2481 = vmatmul.mubr.msk.f32.gmra.mrb[92].mxu0 %vm127_vm0, %v81_v40 }
  0xcf   :  { %666 = vmatprep.mubr.f32.mxu0 %v3111_v8 }
  0xd2   :  { %2482 = vmatmul.mubr.msk.f32.gmra.mrb[94].mxu0 %vm127_vm0, %v82_v41  ;;  %v2965_v41 = vpack.c.bf16 %v1573_v37, %v1572_v36 }
  0xd3   :  { %672 = vmatprep.mubr.f32.mxu0 %v3111_v8 }
  0xd4   :  { %2966 = vmatprep.subr.bf16.mxu0 %v2965_v41 }
  0xd5   :  { %2968 = vmatpush3.bf16.msra.mxu0 %v2965_v41 }
  0xd6   :  { %2483 = vmatmul.mubr.msk.f32.gmra.mrb[96].mxu0 %vm127_vm0, %v83_v42 }
  0xd7   :  { %678 = vmatprep.mubr.f32.mxu0 %v3111_v8 }
  0xda   :  { %2484 = vmatmul.mubr.msk.f32.gmra.mrb[98].mxu0 %vm127_vm0, %v84_v43  ;;  %v94_v43 = vld [vmem:[%s4146_s0 + $0x1d8] sm:$0xff] }
  0xdb   :  { %684 = vmatprep.mubr.f32.mxu0 %v3111_v8 }
  0xde   :  { %2485 = vmatmul.mubr.msk.f32.gmra.mrb[100].mxu0 %vm127_vm0, %v85_v45 }
  0xdf   :  { %690 = vmatprep.mubr.f32.mxu0 %v3111_v8 }
  0xe2   :  { %2486 = vmatmul.mubr.msk.f32.gmra.mrb[102].mxu0 %vm127_vm0, %v86_v47 }
  0xe3   :  { %696 = vmatprep.mubr.f32.mxu0 %v3111_v8 }
  0xe6   :  { %2487 = vmatmul.mubr.msk.f32.gmra.mrb[104].mxu0 %vm127_vm0, %v87_v51 }
  0xe7   :  { %702 = vmatprep.mubr.f32.mxu0 %v3111_v8 }
  0xe9   :  { %v386_v55 = vpop.f32.mrb[0].mxu0 }
  0xea   :  { %v387_v56 = vadd.f32 %v386_v55, %v3561_v52  ;;  %v388_v57 = vpop.f32.mrb[1].mxu0  ;;  %2488 = vmatmul.mubr.msk.f32.gmra.mrb[106].mxu0 %vm127_vm0, %v88_v54 }
  0xeb   :  { %v389_v58 = vadd.f32 %v388_v57, %v3564_v53  ;;  %708 = vmatprep.mubr.f32.mxu0 %v3111_v8 }
  0xec   :  { %v769_v62 = vmax.f32 %v387_v56, 0.0  ;;  %v2969_v56 = vpack.c.bf16 %v1575_v50, %v1574_v49 }
  0xed   :  { %v770_v60 = vmax.f32 %v389_v58, 0.0  ;;  %v392_v61 = vpop.f32.mrb[2].mxu0  ;;  %v95_v58 = vld [vmem:[%s4146_s0 + $0x1e0] sm:$0xff] }
  0xee   :  { %v393_v63 = vadd.f32 %v392_v61, %v3561_v52  ;;  %v394_v0 = vpop.f32.mrb[3].mxu0  ;;  %2489 = vmatmul.mubr.msk.f32.gmra.mrb[108].mxu0 %vm127_vm0, %v89_v59  ;;  %2970 = vmatprep.subr.bf16.mxu0 %v2969_v56  ;;  %v1576_v61 = vld [vmem:[%s4151_s5 + $0x50] sm:$0xff] }
  0xef   :  { %v395_v1 = vadd.f32 %v394_v0, %v3564_v53  ;;  %2500 = vmatprep.mubr.msk.f32.mxu1 %vm924_vm1, %v770_v60  ;;  %714 = vmatprep.mubr.f32.mxu0 %v3111_v8 }
  0xf0   :  { %1182 = vmatmul.mubr.f32.vlgmr.msra.gmra.mrb[0].mxu1 %v769_v62  ;;  %v771_v7 = vmax.f32 %v393_v63, 0.0  ;;  %2972 = vmatpush3.bf16.msra.mxu0 %v2969_v56  ;;  %v1577_v62 = vld [vmem:[%s4151_s5 + $0x58] sm:$0xff] }
  0xf1   :  { %v772_v3 = vmax.f32 %v395_v1, 0.0  ;;  %v398_v4 = vpop.f32.mrb[4].mxu0 }
  0xf2   :  { %v399_v9 = vadd.f32 %v398_v4, %v3561_v52  ;;  %v400_v10 = vpop.f32.mrb[5].mxu0  ;;  %2490 = vmatmul.mubr.msk.f32.gmra.mrb[110].mxu0 %vm127_vm0, %v90_v2  ;;  %v2973_v2 = vpack.c.bf16 %v1577_v62, %v1576_v61  ;;  %v96_v4 = vld [vmem:[%s4146_s0 + $0x1e8] sm:$0xff] }
  0xf3   :  { %v401_v12 = vadd.f32 %v400_v10, %v3564_v53  ;;  %2501 = vmatprep.mubr.msk.f32.mxu1 %vm924_vm1, %v772_v3  ;;  %720 = vmatprep.mubr.f32.mxu0 %v3111_v8 }
  0xf4   :  { %1187 = vmatmul.mubr.f32.gmra.mrb[2].mxu1 %v771_v7  ;;  %v773_v18 = vmax.f32 %v399_v9, 0.0  ;;  %2974 = vmatprep.subr.bf16.mxu0 %v2973_v2 }
  0xf5   :  { %v774_v14 = vmax.f32 %v401_v12, 0.0  ;;  %v404_v15 = vpop.f32.mrb[6].mxu0  ;;  %2976 = vmatpush3.bf16.msra.mxu0 %v2973_v2  ;;  %v97_v12 = vld [vmem:[%s4146_s0 + $0x1f0] sm:$0xff] }
  0xf6   :  { %v405_v19 = vadd.f32 %v404_v15, %v3561_v52  ;;  %v406_v20 = vpop.f32.mrb[7].mxu0  ;;  %2491 = vmatmul.mubr.msk.f32.gmra.mrb[112].mxu0 %vm127_vm0, %v91_v13 }
  0xf7   :  { %v407_v22 = vadd.f32 %v406_v20, %v3564_v53  ;;  %2502 = vmatprep.mubr.msk.f32.mxu1 %vm924_vm1, %v774_v14  ;;  %726 = vmatprep.mubr.f32.mxu0 %v3111_v8 }
  0xf8   :  { %1192 = vmatmul.mubr.f32.gmra.mrb[4].mxu1 %v773_v18  ;;  %v775_v28 = vmax.f32 %v405_v19, 0.0  ;;  %v98_v19 = vld [vmem:[%s4146_s0 + $0x1f8] sm:$0xff] }
  0xf9   :  { %v776_v24 = vmax.f32 %v407_v22, 0.0  ;;  %v410_v25 = vpop.f32.mrb[8].mxu0 }
  0xfa   :  { %v411_v29 = vadd.f32 %v410_v25, %v3561_v52  ;;  %v412_v30 = vpop.f32.mrb[9].mxu0  ;;  %2492 = vmatmul.mubr.msk.f32.gmra.mrb[114].mxu0 %vm127_vm0, %v92_v23 }
  0xfb   :  { %v413_v32 = vadd.f32 %v412_v30, %v3564_v53  ;;  %2503 = vmatprep.mubr.msk.f32.mxu1 %vm924_vm1, %v776_v24  ;;  %732 = vmatprep.mubr.f32.mxu0 %v3111_v8 }
  0xfc   :  { %1197 = vmatmul.mubr.f32.gmra.mrb[6].mxu1 %v775_v28  ;;  %v777_v38 = vmax.f32 %v411_v29, 0.0 }
  0xfd   :  { %v778_v34 = vmax.f32 %v413_v32, 0.0  ;;  %v416_v35 = vpop.f32.mrb[10].mxu0 }
  0xfe   :  { %v417_v39 = vadd.f32 %v416_v35, %v3561_v52  ;;  %v418_v40 = vpop.f32.mrb[11].mxu0  ;;  %2493 = vmatmul.mubr.msk.f32.gmra.mrb[116].mxu0 %vm127_vm0, %v93_v33 }
  0xff   :  { %v419_v42 = vadd.f32 %v418_v40, %v3564_v53  ;;  %2504 = vmatprep.mubr.msk.f32.mxu1 %vm924_vm1, %v778_v34  ;;  %738 = vmatprep.mubr.f32.mxu0 %v3111_v8 }
 0x100   :  { %1202 = vmatmul.mubr.f32.gmra.mrb[8].mxu1 %v777_v38  ;;  %v779_v51 = vmax.f32 %v417_v39, 0.0 }
 0x101   :  { %v780_v45 = vmax.f32 %v419_v42, 0.0  ;;  %v422_v47 = vpop.f32.mrb[12].mxu0 }
 0x102   :  { %v423_v54 = vadd.f32 %v422_v47, %v3561_v52  ;;  %v424_v55 = vpop.f32.mrb[13].mxu0  ;;  %2494 = vmatmul.mubr.msk.f32.gmra.mrb[118].mxu0 %vm127_vm0, %v94_v43 }
 0x103   :  { %v425_v57 = vadd.f32 %v424_v55, %v3564_v53  ;;  %2505 = vmatprep.mubr.msk.f32.mxu1 %vm924_vm1, %v780_v45  ;;  %744 = vmatprep.mubr.f32.mxu0 %v3111_v8 }
 0x104   :  { %1207 = vmatmul.mubr.f32.gmra.mrb[10].mxu1 %v779_v51  ;;  %v781_v63 = vmax.f32 %v423_v54, 0.0 }
 0x105   :  { %v782_v59 = vmax.f32 %v425_v57, 0.0  ;;  %v428_v60 = vpop.f32.mrb[14].mxu0 }
 0x106   :  { %v429_v0 = vadd.f32 %v428_v60, %v3561_v52  ;;  %v430_v1 = vpop.f32.mrb[15].mxu0  ;;  %2495 = vmatmul.mubr.msk.f32.gmra.mrb[120].mxu0 %vm127_vm0, %v95_v58 }
 0x107   :  { %v431_v3 = vadd.f32 %v430_v1, %v3564_v53  ;;  %2506 = vmatprep.mubr.msk.f32.mxu1 %vm924_vm1, %v782_v59  ;;  %750 = vmatprep.mubr.f32.mxu0 %v3111_v8 }
 0x108   :  { %1212 = vmatmul.mubr.f32.gmra.mrb[12].mxu1 %v781_v63  ;;  %v783_v7 = vmax.f32 %v429_v0, 0.0 }
 0x109   :  { %v784_v5 = vmax.f32 %v431_v3, 0.0  ;;  %v434_v6 = vpop.f32.mrb[16].mxu0 }
 0x10a   :  { %v435_v9 = vadd.f32 %v434_v6, %v3561_v52  ;;  %v436_v10 = vpop.f32.mrb[17].mxu0  ;;  %2496 = vmatmul.mubr.msk.f32.gmra.mrb[122].mxu0 %vm127_vm0, %v96_v4 }
 0x10b   :  { %v437_v11 = vadd.f32 %v436_v10, %v3564_v53  ;;  %2507 = vmatprep.mubr.msk.f32.mxu1 %vm924_vm1, %v784_v5  ;;  %756 = vmatprep.mubr.f32.mxu0 %v3111_v8 }
 0x10c   :  { %1217 = vmatmul.mubr.f32.gmra.mrb[14].mxu1 %v783_v7  ;;  %v785_v15 = vmax.f32 %v435_v9, 0.0 }
 0x10d   :  { %v786_v13 = vmax.f32 %v437_v11, 0.0  ;;  %v440_v14 = vpop.f32.mrb[18].mxu0 }
 0x10e   :  { %v441_v16 = vadd.f32 %v440_v14, %v3561_v52  ;;  %v442_v17 = vpop.f32.mrb[19].mxu0  ;;  %2497 = vmatmul.mubr.msk.f32.gmra.mrb[124].mxu0 %vm127_vm0, %v97_v12 }
 0x10f   :  { %v443_v18 = vadd.f32 %v442_v17, %v3564_v53  ;;  %2508 = vmatprep.mubr.msk.f32.mxu1 %vm924_vm1, %v786_v13  ;;  %762 = vmatprep.mubr.f32.mxu0 %v3111_v8 }
 0x110   :  { %1222 = vmatmul.mubr.f32.gmra.mrb[16].mxu1 %v785_v15  ;;  %v787_v22 = vmax.f32 %v441_v16, 0.0 }
 0x111   :  { %v788_v20 = vmax.f32 %v443_v18, 0.0  ;;  %v446_v21 = vpop.f32.mrb[20].mxu0 }
 0x112   :  { %v447_v23 = vadd.f32 %v446_v21, %v3561_v52  ;;  %v448_v24 = vpop.f32.mrb[21].mxu0  ;;  %2498 = vmatmul.mubr.msk.f32.gmra.mrb[126].mxu0 %vm127_vm0, %v98_v19 }
 0x113   :  { %v449_v25 = vadd.f32 %v448_v24, %v3564_v53  ;;  %2509 = vmatprep.mubr.msk.f32.mxu1 %vm924_vm1, %v788_v20 }
 0x114   :  { %1227 = vmatmul.mubr.f32.gmra.mrb[18].mxu1 %v787_v22  ;;  %v789_v27 = vmax.f32 %v447_v23, 0.0 }
 0x115   :  { %v790_v26 = vmax.f32 %v449_v25, 0.0  ;;  %v452_v8 = vpop.f32.mrb[22].mxu0 }
 0x116   :  { %v453_v28 = vadd.f32 %v452_v8, %v3561_v52  ;;  %v454_v29 = vpop.f32.mrb[23].mxu0 }
 0x117   :  { %v455_v30 = vadd.f32 %v454_v29, %v3564_v53  ;;  %2510 = vmatprep.mubr.msk.f32.mxu1 %vm924_vm1, %v790_v26 }
 0x118   :  { %1232 = vmatmul.mubr.f32.gmra.mrb[20].mxu1 %v789_v27  ;;  %v791_v33 = vmax.f32 %v453_v28, 0.0 }
 0x119   :  { %v792_v31 = vmax.f32 %v455_v30, 0.0  ;;  %v458_v32 = vpop.f32.mrb[24].mxu0 }
 0x11a   :  { %v459_v34 = vadd.f32 %v458_v32, %v3561_v52  ;;  %v460_v35 = vpop.f32.mrb[25].mxu0 }
 0x11b   :  { %v461_v36 = vadd.f32 %v460_v35, %v3564_v53  ;;  %2511 = vmatprep.mubr.msk.f32.mxu1 %vm924_vm1, %v792_v31  ;;  %v1579_v35 = vld [vmem:[%s4151_s5 + $0x68] sm:$0xff] }
 0x11c   :  { %1237 = vmatmul.mubr.f32.gmra.mrb[22].mxu1 %v791_v33  ;;  %v793_v39 = vmax.f32 %v459_v34, 0.0  ;;  %v1578_v34 = vld [vmem:[%s4151_s5 + $0x60] sm:$0xff] }
 0x11d   :  { %v794_v37 = vmax.f32 %v461_v36, 0.0  ;;  %v464_v38 = vpop.f32.mrb[26].mxu0 }
 0x11e   :  { %v465_v40 = vadd.f32 %v464_v38, %v3561_v52  ;;  %v466_v41 = vpop.f32.mrb[27].mxu0 }
 0x11f   :  { %v467_v42 = vadd.f32 %v466_v41, %v3564_v53  ;;  %2512 = vmatprep.mubr.msk.f32.mxu1 %vm924_vm1, %v794_v37 }
 0x120   :  { %1242 = vmatmul.mubr.f32.gmra.mrb[24].mxu1 %v793_v39  ;;  %v795_v47 = vmax.f32 %v465_v40, 0.0  ;;  %v2977_v39 = vpack.c.bf16 %v1579_v35, %v1578_v34 }
 0x121   :  { %v796_v43 = vmax.f32 %v467_v42, 0.0  ;;  %v470_v45 = vpop.f32.mrb[28].mxu0 }
 0x122   :  { %v471_v49 = vadd.f32 %v470_v45, %v3561_v52  ;;  %v472_v50 = vpop.f32.mrb[29].mxu0  ;;  %2978 = vmatprep.subr.bf16.mxu0 %v2977_v39  ;;  %v1581_v45 = vld [vmem:[%s4151_s5 + $0x78] sm:$0xff] }
 0x123   :  { %v473_v51 = vadd.f32 %v472_v50, %v3564_v53  ;;  %2513 = vmatprep.mubr.msk.f32.mxu1 %vm924_vm1, %v796_v43  ;;  %2980 = vmatpush3.bf16.msra.mxu0 %v2977_v39  ;;  %v1580_v43 = vld [vmem:[%s4151_s5 + $0x70] sm:$0xff] }
 0x124   :  { %1247 = vmatmul.mubr.f32.gmra.mrb[26].mxu1 %v795_v47  ;;  %v797_v56 = vmax.f32 %v471_v49, 0.0 }
 0x125   :  { %v798_v54 = vmax.f32 %v473_v51, 0.0  ;;  %v476_v55 = vpop.f32.mrb[30].mxu0  ;;  %v2981_v51 = vpack.c.bf16 %v1581_v45, %v1580_v43 }
 0x126   :  { %v477_v57 = vadd.f32 %v476_v55, %v3561_v52  ;;  %v478_v58 = vpop.f32.mrb[31].mxu0 }
 0x127   :  { %v479_v59 = vadd.f32 %v478_v58, %v3564_v53  ;;  %2514 = vmatprep.mubr.msk.f32.mxu1 %vm924_vm1, %v798_v54  ;;  %2982 = vmatprep.subr.bf16.mxu0 %v2981_v51 }
 0x128   :  { %1252 = vmatmul.mubr.f32.gmra.mrb[28].mxu1 %v797_v56  ;;  %v799_v62 = vmax.f32 %v477_v57, 0.0  ;;  %2984 = vmatpush3.bf16.msra.mxu0 %v2981_v51 }
 0x129   :  { %v800_v60 = vmax.f32 %v479_v59, 0.0  ;;  %v482_v61 = vpop.f32.mrb[32].mxu0 }
 0x12a   :  { %v483_v63 = vadd.f32 %v482_v61, %v3561_v52  ;;  %v484_v0 = vpop.f32.mrb[33].mxu0 }
 0x12b   :  { %v485_v1 = vadd.f32 %v484_v0, %v3564_v53  ;;  %2515 = vmatprep.mubr.msk.f32.mxu1 %vm924_vm1, %v800_v60 }
 0x12c   :  { %1257 = vmatmul.mubr.f32.gmra.mrb[30].mxu1 %v799_v62  ;;  %v801_v4 = vmax.f32 %v483_v63, 0.0 }
 0x12d   :  { %v802_v2 = vmax.f32 %v485_v1, 0.0  ;;  %v488_v3 = vpop.f32.mrb[34].mxu0 }
 0x12e   :  { %v489_v5 = vadd.f32 %v488_v3, %v3561_v52  ;;  %v490_v6 = vpop.f32.mrb[35].mxu0 }
 0x12f   :  { %v491_v7 = vadd.f32 %v490_v6, %v3564_v53  ;;  %2516 = vmatprep.mubr.msk.f32.mxu1 %vm924_vm1, %v802_v2 }
 0x130   :  { %1262 = vmatmul.mubr.f32.gmra.mrb[32].mxu1 %v801_v4  ;;  %v803_v11 = vmax.f32 %v489_v5, 0.0 }
 0x131   :  { %v804_v9 = vmax.f32 %v491_v7, 0.0  ;;  %v494_v10 = vpop.f32.mrb[36].mxu0 }
 0x132   :  { %v495_v12 = vadd.f32 %v494_v10, %v3561_v52  ;;  %v496_v13 = vpop.f32.mrb[37].mxu0 }
 0x133   :  { %v497_v14 = vadd.f32 %v496_v13, %v3564_v53  ;;  %2517 = vmatprep.mubr.msk.f32.mxu1 %vm924_vm1, %v804_v9 }
 0x134   :  { %1267 = vmatmul.mubr.f32.gmra.mrb[34].mxu1 %v803_v11  ;;  %v805_v17 = vmax.f32 %v495_v12, 0.0 }
 0x135   :  { %v806_v15 = vmax.f32 %v497_v14, 0.0  ;;  %v500_v16 = vpop.f32.mrb[38].mxu0 }
 0x136   :  { %v501_v18 = vadd.f32 %v500_v16, %v3561_v52  ;;  %v502_v19 = vpop.f32.mrb[39].mxu0 }
 0x137   :  { %v503_v20 = vadd.f32 %v502_v19, %v3564_v53  ;;  %2518 = vmatprep.mubr.msk.f32.mxu1 %vm924_vm1, %v806_v15 }
 0x138   :  { %1272 = vmatmul.mubr.f32.gmra.mrb[36].mxu1 %v805_v17  ;;  %v807_v23 = vmax.f32 %v501_v18, 0.0 }
 0x139   :  { %v808_v21 = vmax.f32 %v503_v20, 0.0  ;;  %v506_v22 = vpop.f32.mrb[40].mxu0 }
 0x13a   :  { %v507_v24 = vadd.f32 %v506_v22, %v3561_v52  ;;  %v508_v25 = vpop.f32.mrb[41].mxu0 }
 0x13b   :  { %v509_v26 = vadd.f32 %v508_v25, %v3564_v53  ;;  %2519 = vmatprep.mubr.msk.f32.mxu1 %vm924_vm1, %v808_v21 }
 0x13c   :  { %1277 = vmatmul.mubr.f32.gmra.mrb[38].mxu1 %v807_v23  ;;  %v809_v28 = vmax.f32 %v507_v24, 0.0 }
 0x13d   :  { %v810_v8 = vmax.f32 %v509_v26, 0.0  ;;  %v512_v27 = vpop.f32.mrb[42].mxu0 }
 0x13e   :  { %v513_v29 = vadd.f32 %v512_v27, %v3561_v52  ;;  %v514_v30 = vpop.f32.mrb[43].mxu0 }
 0x13f   :  { %v515_v31 = vadd.f32 %v514_v30, %v3564_v53  ;;  %2520 = vmatprep.mubr.msk.f32.mxu1 %vm924_vm1, %v810_v8 }
 0x140   :  { %1282 = vmatmul.mubr.f32.gmra.mrb[40].mxu1 %v809_v28  ;;  %v811_v36 = vmax.f32 %v513_v29, 0.0 }
 0x141   :  { %v812_v32 = vmax.f32 %v515_v31, 0.0  ;;  %v518_v33 = vpop.f32.mrb[44].mxu0 }
 0x142   :  { %v519_v37 = vadd.f32 %v518_v33, %v3561_v52  ;;  %v520_v38 = vpop.f32.mrb[45].mxu0 }
 0x143   :  { %v521_v40 = vadd.f32 %v520_v38, %v3564_v53  ;;  %2521 = vmatprep.mubr.msk.f32.mxu1 %vm924_vm1, %v812_v32 }
 0x144   :  { %1287 = vmatmul.mubr.f32.gmra.mrb[42].mxu1 %v811_v36  ;;  %v813_v47 = vmax.f32 %v519_v37, 0.0 }
 0x145   :  { %v814_v41 = vmax.f32 %v521_v40, 0.0  ;;  %v524_v42 = vpop.f32.mrb[46].mxu0 }
 0x146   :  { %v525_v49 = vadd.f32 %v524_v42, %v3561_v52  ;;  %v526_v50 = vpop.f32.mrb[47].mxu0 }
 0x147   :  { %v527_v54 = vadd.f32 %v526_v50, %v3564_v53  ;;  %2522 = vmatprep.mubr.msk.f32.mxu1 %vm924_vm1, %v814_v41 }
 0x148   :  { %1292 = vmatmul.mubr.f32.gmra.mrb[44].mxu1 %v813_v47  ;;  %v815_v57 = vmax.f32 %v525_v49, 0.0 }
 0x149   :  { %v816_v55 = vmax.f32 %v527_v54, 0.0  ;;  %v530_v56 = vpop.f32.mrb[48].mxu0 }
 0x14a   :  { %v531_v58 = vadd.f32 %v530_v56, %v3561_v52  ;;  %v532_v59 = vpop.f32.mrb[49].mxu0 }
 0x14b   :  { %v533_v60 = vadd.f32 %v532_v59, %v3564_v53  ;;  %2523 = vmatprep.mubr.msk.f32.mxu1 %vm924_vm1, %v816_v55 }
 0x14c   :  { %1297 = vmatmul.mubr.f32.gmra.mrb[46].mxu1 %v815_v57  ;;  %v817_v63 = vmax.f32 %v531_v58, 0.0 }
 0x14d   :  { %v818_v61 = vmax.f32 %v533_v60, 0.0  ;;  %v536_v62 = vpop.f32.mrb[50].mxu0 }
 0x14e   :  { %v537_v0 = vadd.f32 %v536_v62, %v3561_v52  ;;  %v538_v1 = vpop.f32.mrb[51].mxu0 }
 0x14f   :  { %v539_v2 = vadd.f32 %v538_v1, %v3564_v53  ;;  %2524 = vmatprep.mubr.msk.f32.mxu1 %vm924_vm1, %v818_v61 }
 0x150   :  { %1302 = vmatmul.mubr.f32.gmra.mrb[48].mxu1 %v817_v63  ;;  %v819_v5 = vmax.f32 %v537_v0, 0.0 }
 0x151   :  { %v820_v3 = vmax.f32 %v539_v2, 0.0  ;;  %v542_v4 = vpop.f32.mrb[52].mxu0 }
 0x152   :  { %v543_v6 = vadd.f32 %v542_v4, %v3561_v52  ;;  %v544_v7 = vpop.f32.mrb[53].mxu0 }
 0x153   :  { %v545_v9 = vadd.f32 %v544_v7, %v3564_v53  ;;  %2525 = vmatprep.mubr.msk.f32.mxu1 %vm924_vm1, %v820_v3 }
 0x154   :  { %1307 = vmatmul.mubr.f32.gmra.mrb[50].mxu1 %v819_v5  ;;  %v821_v12 = vmax.f32 %v543_v6, 0.0 }
 0x155   :  { %v822_v10 = vmax.f32 %v545_v9, 0.0  ;;  %v548_v11 = vpop.f32.mrb[54].mxu0 }
 0x156   :  { %v549_v13 = vadd.f32 %v548_v11, %v3561_v52  ;;  %v550_v14 = vpop.f32.mrb[55].mxu0 }
 0x157   :  { %v551_v15 = vadd.f32 %v550_v14, %v3564_v53  ;;  %2526 = vmatprep.mubr.msk.f32.mxu1 %vm924_vm1, %v822_v10 }
 0x158   :  { %1312 = vmatmul.mubr.f32.gmra.mrb[52].mxu1 %v821_v12  ;;  %v823_v18 = vmax.f32 %v549_v13, 0.0 }
 0x159   :  { %v824_v16 = vmax.f32 %v551_v15, 0.0  ;;  %v554_v17 = vpop.f32.mrb[56].mxu0 }
 0x15a   :  { %v555_v19 = vadd.f32 %v554_v17, %v3561_v52  ;;  %v556_v20 = vpop.f32.mrb[57].mxu0 }
 0x15b   :  { %v557_v21 = vadd.f32 %v556_v20, %v3564_v53  ;;  %2527 = vmatprep.mubr.msk.f32.mxu1 %vm924_vm1, %v824_v16 }
 0x15c   :  { %1317 = vmatmul.mubr.f32.gmra.mrb[54].mxu1 %v823_v18  ;;  %v825_v24 = vmax.f32 %v555_v19, 0.0 }
 0x15d   :  { %v826_v22 = vmax.f32 %v557_v21, 0.0  ;;  %v560_v23 = vpop.f32.mrb[58].mxu0 }
 0x15e   :  { %v561_v25 = vadd.f32 %v560_v23, %v3561_v52  ;;  %v562_v26 = vpop.f32.mrb[59].mxu0 }
 0x15f   :  { %v563_v8 = vadd.f32 %v562_v26, %v3564_v53  ;;  %2528 = vmatprep.mubr.msk.f32.mxu1 %vm924_vm1, %v826_v22 }
 0x160   :  { %1322 = vmatmul.mubr.f32.gmra.mrb[56].mxu1 %v825_v24  ;;  %v827_v29 = vmax.f32 %v561_v25, 0.0 }
 0x161   :  { %v828_v27 = vmax.f32 %v563_v8, 0.0  ;;  %v566_v28 = vpop.f32.mrb[60].mxu0 }
 0x162   :  { %v567_v30 = vadd.f32 %v566_v28, %v3561_v52  ;;  %v568_v31 = vpop.f32.mrb[61].mxu0 }
 0x163   :  { %v569_v32 = vadd.f32 %v568_v31, %v3564_v53  ;;  %2529 = vmatprep.mubr.msk.f32.mxu1 %vm924_vm1, %v828_v27 }
 0x164   :  { %1327 = vmatmul.mubr.f32.gmra.mrb[58].mxu1 %v827_v29  ;;  %v829_v35 = vmax.f32 %v567_v30, 0.0 }
 0x165   :  { %v830_v33 = vmax.f32 %v569_v32, 0.0  ;;  %v572_v34 = vpop.f32.mrb[62].mxu0 }
 0x166   :  { %v573_v36 = vadd.f32 %v572_v34, %v3561_v52  ;;  %v574_v37 = vpop.f32.mrb[63].mxu0 }
 0x167   :  { %v575_v38 = vadd.f32 %v574_v37, %v3564_v53  ;;  %2530 = vmatprep.mubr.msk.f32.mxu1 %vm924_vm1, %v830_v33 }
 0x168   :  { %1332 = vmatmul.mubr.f32.gmra.mrb[60].mxu1 %v829_v35  ;;  %v831_v41 = vmax.f32 %v573_v36, 0.0 }
 0x169   :  { %v832_v39 = vmax.f32 %v575_v38, 0.0  ;;  %v578_v40 = vpop.f32.mrb[64].mxu0 }
 0x16a   :  { %v579_v42 = vadd.f32 %v578_v40, %v3561_v52  ;;  %v580_v43 = vpop.f32.mrb[65].mxu0 }
 0x16b   :  { %2531 = vmatprep.mubr.msk.f32.mxu1 %vm924_vm1, %v832_v39  ;;  %v581_v45 = vadd.f32 %v580_v43, %v3564_v53 }
 0x16c   :  { %1337 = vmatmul.mubr.f32.gmra.mrb[62].mxu1 %v831_v41  ;;  %v833_v50 = vmax.f32 %v579_v42, 0.0 }
 0x16d   :  { %v834_v47 = vmax.f32 %v581_v45, 0.0  ;;  %v584_v49 = vpop.f32.mrb[66].mxu0 }
 0x16e   :  { %v585_v51 = vadd.f32 %v584_v49, %v3561_v52  ;;  %v586_v54 = vpop.f32.mrb[67].mxu0 }
 0x16f   :  { %v587_v55 = vadd.f32 %v586_v54, %v3564_v53  ;;  %2532 = vmatprep.mubr.msk.f32.mxu1 %vm924_vm1, %v834_v47 }
 0x170   :  { %1342 = vmatmul.mubr.f32.gmra.mrb[64].mxu1 %v833_v50  ;;  %v835_v58 = vmax.f32 %v585_v51, 0.0 }
 0x171   :  { %v836_v56 = vmax.f32 %v587_v55, 0.0  ;;  %v590_v57 = vpop.f32.mrb[68].mxu0 }
 0x172   :  { %v591_v59 = vadd.f32 %v590_v57, %v3561_v52  ;;  %v592_v60 = vpop.f32.mrb[69].mxu0 }
 0x173   :  { %v593_v61 = vadd.f32 %v592_v60, %v3564_v53  ;;  %2533 = vmatprep.mubr.msk.f32.mxu1 %vm924_vm1, %v836_v56 }
 0x174   :  { %1347 = vmatmul.mubr.f32.gmra.mrb[66].mxu1 %v835_v58  ;;  %v837_v0 = vmax.f32 %v591_v59, 0.0 }
 0x175   :  { %v838_v62 = vmax.f32 %v593_v61, 0.0  ;;  %v596_v63 = vpop.f32.mrb[70].mxu0 }
 0x176   :  { %v597_v1 = vadd.f32 %v596_v63, %v3561_v52  ;;  %v598_v2 = vpop.f32.mrb[71].mxu0 }
 0x177   :  { %v599_v3 = vadd.f32 %v598_v2, %v3564_v53  ;;  %2534 = vmatprep.mubr.msk.f32.mxu1 %vm924_vm1, %v838_v62 }
 0x178   :  { %1352 = vmatmul.mubr.f32.gmra.mrb[68].mxu1 %v837_v0  ;;  %v839_v6 = vmax.f32 %v597_v1, 0.0 }
 0x179   :  { %v840_v4 = vmax.f32 %v599_v3, 0.0  ;;  %v602_v5 = vpop.f32.mrb[72].mxu0 }
 0x17a   :  { %v603_v7 = vadd.f32 %v602_v5, %v3561_v52  ;;  %v604_v9 = vpop.f32.mrb[73].mxu0 }
 0x17b   :  { %v605_v10 = vadd.f32 %v604_v9, %v3564_v53  ;;  %2535 = vmatprep.mubr.msk.f32.mxu1 %vm924_vm1, %v840_v4 }
 0x17c   :  { %1357 = vmatmul.mubr.f32.gmra.mrb[70].mxu1 %v839_v6  ;;  %v841_v13 = vmax.f32 %v603_v7, 0.0 }
 0x17d   :  { %v842_v11 = vmax.f32 %v605_v10, 0.0  ;;  %v608_v12 = vpop.f32.mrb[74].mxu0 }
 0x17e   :  { %v609_v14 = vadd.f32 %v608_v12, %v3561_v52  ;;  %v610_v15 = vpop.f32.mrb[75].mxu0 }
 0x17f   :  { %v611_v16 = vadd.f32 %v610_v15, %v3564_v53  ;;  %2536 = vmatprep.mubr.msk.f32.mxu1 %vm924_vm1, %v842_v11 }
 0x180   :  { %1362 = vmatmul.mubr.f32.gmra.mrb[72].mxu1 %v841_v13  ;;  %v843_v19 = vmax.f32 %v609_v14, 0.0 }
 0x181   :  { %v844_v17 = vmax.f32 %v611_v16, 0.0  ;;  %v614_v18 = vpop.f32.mrb[76].mxu0 }
 0x182   :  { %v615_v20 = vadd.f32 %v614_v18, %v3561_v52  ;;  %v616_v21 = vpop.f32.mrb[77].mxu0 }
 0x183   :  { %v617_v22 = vadd.f32 %v616_v21, %v3564_v53  ;;  %2537 = vmatprep.mubr.msk.f32.mxu1 %vm924_vm1, %v844_v17 }
 0x184   :  { %1367 = vmatmul.mubr.f32.gmra.mrb[74].mxu1 %v843_v19  ;;  %v845_v25 = vmax.f32 %v615_v20, 0.0 }
 0x185   :  { %v846_v23 = vmax.f32 %v617_v22, 0.0  ;;  %v620_v24 = vpop.f32.mrb[78].mxu0 }
 0x186   :  { %v621_v26 = vadd.f32 %v620_v24, %v3561_v52  ;;  %v622_v8 = vpop.f32.mrb[79].mxu0 }
 0x187   :  { %v623_v27 = vadd.f32 %v622_v8, %v3564_v53  ;;  %2538 = vmatprep.mubr.msk.f32.mxu1 %vm924_vm1, %v846_v23 }
 0x188   :  { %1372 = vmatmul.mubr.f32.gmra.mrb[76].mxu1 %v845_v25  ;;  %v847_v30 = vmax.f32 %v621_v26, 0.0 }
 0x189   :  { %v848_v28 = vmax.f32 %v623_v27, 0.0  ;;  %v626_v29 = vpop.f32.mrb[80].mxu0 }
 0x18a   :  { %v627_v31 = vadd.f32 %v626_v29, %v3561_v52  ;;  %v628_v32 = vpop.f32.mrb[81].mxu0 }
 0x18b   :  { %v629_v33 = vadd.f32 %v628_v32, %v3564_v53  ;;  %2539 = vmatprep.mubr.msk.f32.mxu1 %vm924_vm1, %v848_v28 }
 0x18c   :  { %1377 = vmatmul.mubr.f32.gmra.mrb[78].mxu1 %v847_v30  ;;  %v849_v36 = vmax.f32 %v627_v31, 0.0 }
 0x18d   :  { %v850_v34 = vmax.f32 %v629_v33, 0.0  ;;  %v632_v35 = vpop.f32.mrb[82].mxu0 }
 0x18e   :  { %v633_v37 = vadd.f32 %v632_v35, %v3561_v52  ;;  %v634_v38 = vpop.f32.mrb[83].mxu0 }
 0x18f   :  { %v635_v39 = vadd.f32 %v634_v38, %v3564_v53  ;;  %2540 = vmatprep.mubr.msk.f32.mxu1 %vm924_vm1, %v850_v34 }
 0x190   :  { %1382 = vmatmul.mubr.f32.gmra.mrb[80].mxu1 %v849_v36  ;;  %v851_v42 = vmax.f32 %v633_v37, 0.0 }
 0x191   :  { %v852_v40 = vmax.f32 %v635_v39, 0.0  ;;  %v638_v41 = vpop.f32.mrb[84].mxu0 }
 0x192   :  { %v639_v43 = vadd.f32 %v638_v41, %v3561_v52  ;;  %v640_v45 = vpop.f32.mrb[85].mxu0 }
 0x193   :  { %v641_v47 = vadd.f32 %v640_v45, %v3564_v53  ;;  %2541 = vmatprep.mubr.msk.f32.mxu1 %vm924_vm1, %v852_v40 }
 0x194   :  { %1387 = vmatmul.mubr.f32.gmra.mrb[82].mxu1 %v851_v42  ;;  %v853_v51 = vmax.f32 %v639_v43, 0.0 }
 0x195   :  { %v854_v49 = vmax.f32 %v641_v47, 0.0  ;;  %v644_v50 = vpop.f32.mrb[86].mxu0 }
 0x196   :  { %v645_v54 = vadd.f32 %v644_v50, %v3561_v52  ;;  %v646_v55 = vpop.f32.mrb[87].mxu0 }
 0x197   :  { %v647_v56 = vadd.f32 %v646_v55, %v3564_v53  ;;  %2542 = vmatprep.mubr.msk.f32.mxu1 %vm924_vm1, %v854_v49 }
 0x198   :  { %1392 = vmatmul.mubr.f32.gmra.mrb[84].mxu1 %v853_v51  ;;  %v855_v59 = vmax.f32 %v645_v54, 0.0 }
 0x199   :  { %v856_v57 = vmax.f32 %v647_v56, 0.0  ;;  %v650_v58 = vpop.f32.mrb[88].mxu0 }
 0x19a   :  { %v651_v60 = vadd.f32 %v650_v58, %v3561_v52  ;;  %v652_v61 = vpop.f32.mrb[89].mxu0  ;;  %v3833_v58 = vld [vmem:[%s4150_s4] ss:$0 sm:$0xff] }
 0x19b   :  { %v653_v62 = vadd.f32 %v652_v61, %v3564_v53  ;;  %2543 = vmatprep.mubr.msk.f32.mxu1 %vm924_vm1, %v856_v57 }
 0x19c   :  { %1397 = vmatmul.mubr.f32.gmra.mrb[86].mxu1 %v855_v59  ;;  %v857_v1 = vmax.f32 %v651_v60, 0.0 }
 0x19d   :  { %v858_v63 = vmax.f32 %v653_v62, 0.0  ;;  %v656_v0 = vpop.f32.mrb[90].mxu0 }
 0x19e   :  { %v657_v2 = vadd.f32 %v656_v0, %v3561_v52  ;;  %v658_v3 = vpop.f32.mrb[91].mxu0 }
 0x19f   :  { %v659_v4 = vadd.f32 %v658_v3, %v3564_v53  ;;  %2544 = vmatprep.mubr.msk.f32.mxu1 %vm924_vm1, %v858_v63 }
 0x1a0   :  { %1402 = vmatmul.mubr.f32.gmra.mrb[88].mxu1 %v857_v1  ;;  %v859_v7 = vmax.f32 %v657_v2, 0.0 }
 0x1a1   :  { %v860_v5 = vmax.f32 %v659_v4, 0.0  ;;  %v662_v6 = vpop.f32.mrb[92].mxu0 }
 0x1a2   :  { %v663_v9 = vadd.f32 %v662_v6, %v3561_v52  ;;  %v664_v10 = vpop.f32.mrb[93].mxu0 }
 0x1a3   :  { %v665_v11 = vadd.f32 %v664_v10, %v3564_v53  ;;  %2545 = vmatprep.mubr.msk.f32.mxu1 %vm924_vm1, %v860_v5 }
 0x1a4   :  { %1407 = vmatmul.mubr.f32.gmra.mrb[90].mxu1 %v859_v7  ;;  %v861_v14 = vmax.f32 %v663_v9, 0.0 }
 0x1a5   :  { %v862_v12 = vmax.f32 %v665_v11, 0.0  ;;  %v668_v13 = vpop.f32.mrb[94].mxu0 }
 0x1a6   :  { %v669_v15 = vadd.f32 %v668_v13, %v3561_v52  ;;  %v670_v16 = vpop.f32.mrb[95].mxu0 }
 0x1a7   :  { %v671_v17 = vadd.f32 %v670_v16, %v3564_v53  ;;  %2546 = vmatprep.mubr.msk.f32.mxu1 %vm924_vm1, %v862_v12 }
 0x1a8   :  { %1412 = vmatmul.mubr.f32.gmra.mrb[92].mxu1 %v861_v14  ;;  %v863_v20 = vmax.f32 %v669_v15, 0.0 }
 0x1a9   :  { %v864_v18 = vmax.f32 %v671_v17, 0.0  ;;  %v674_v19 = vpop.f32.mrb[96].mxu0 }
 0x1aa   :  { %v675_v21 = vadd.f32 %v674_v19, %v3561_v52  ;;  %v676_v22 = vpop.f32.mrb[97].mxu0 }
 0x1ab   :  { %v677_v23 = vadd.f32 %v676_v22, %v3564_v53  ;;  %2547 = vmatprep.mubr.msk.f32.mxu1 %vm924_vm1, %v864_v18 }
 0x1ac   :  { %1417 = vmatmul.mubr.f32.gmra.mrb[94].mxu1 %v863_v20  ;;  %v865_v26 = vmax.f32 %v675_v21, 0.0 }
 0x1ad   :  { %v866_v24 = vmax.f32 %v677_v23, 0.0  ;;  %v680_v25 = vpop.f32.mrb[98].mxu0 }
 0x1ae   :  { %v681_v8 = vadd.f32 %v680_v25, %v3561_v52  ;;  %v682_v27 = vpop.f32.mrb[99].mxu0 }
 0x1af   :  { %v683_v28 = vadd.f32 %v682_v27, %v3564_v53  ;;  %2548 = vmatprep.mubr.msk.f32.mxu1 %vm924_vm1, %v866_v24 }
 0x1b0   :  { %1422 = vmatmul.mubr.f32.gmra.mrb[96].mxu1 %v865_v26  ;;  %v867_v31 = vmax.f32 %v681_v8, 0.0 }
 0x1b1   :  { %v868_v29 = vmax.f32 %v683_v28, 0.0  ;;  %v686_v30 = vpop.f32.mrb[100].mxu0 }
 0x1b2   :  { %v687_v32 = vadd.f32 %v686_v30, %v3561_v52  ;;  %v688_v33 = vpop.f32.mrb[101].mxu0 }
 0x1b3   :  { %v689_v34 = vadd.f32 %v688_v33, %v3564_v53  ;;  %2549 = vmatprep.mubr.msk.f32.mxu1 %vm924_vm1, %v868_v29 }
 0x1b4   :  { %1427 = vmatmul.mubr.f32.gmra.mrb[98].mxu1 %v867_v31  ;;  %v869_v37 = vmax.f32 %v687_v32, 0.0 }
 0x1b5   :  { %v870_v35 = vmax.f32 %v689_v34, 0.0  ;;  %v692_v36 = vpop.f32.mrb[102].mxu0 }
 0x1b6   :  { %v693_v38 = vadd.f32 %v692_v36, %v3561_v52  ;;  %v694_v39 = vpop.f32.mrb[103].mxu0 }
 0x1b7   :  { %v695_v40 = vadd.f32 %v694_v39, %v3564_v53  ;;  %2550 = vmatprep.mubr.msk.f32.mxu1 %vm924_vm1, %v870_v35 }
 0x1b8   :  { %1432 = vmatmul.mubr.f32.gmra.mrb[100].mxu1 %v869_v37  ;;  %v871_v43 = vmax.f32 %v693_v38, 0.0 }
 0x1b9   :  { %v872_v41 = vmax.f32 %v695_v40, 0.0  ;;  %v698_v42 = vpop.f32.mrb[104].mxu0 }
 0x1ba   :  { %v699_v45 = vadd.f32 %v698_v42, %v3561_v52  ;;  %v700_v47 = vpop.f32.mrb[105].mxu0 }
 0x1bb   :  { %v701_v49 = vadd.f32 %v700_v47, %v3564_v53  ;;  %2551 = vmatprep.mubr.msk.f32.mxu1 %vm924_vm1, %v872_v41 }
 0x1bc   :  { %1437 = vmatmul.mubr.f32.gmra.mrb[102].mxu1 %v871_v43  ;;  %v873_v54 = vmax.f32 %v699_v45, 0.0 }
 0x1bd   :  { %v874_v50 = vmax.f32 %v701_v49, 0.0  ;;  %v704_v51 = vpop.f32.mrb[106].mxu0 }
 0x1be   :  { %v705_v55 = vadd.f32 %v704_v51, %v3561_v52  ;;  %v706_v56 = vpop.f32.mrb[107].mxu0 }
 0x1bf   :  { %v707_v57 = vadd.f32 %v706_v56, %v3564_v53  ;;  %2552 = vmatprep.mubr.msk.f32.mxu1 %vm924_vm1, %v874_v50 }
 0x1c0   :  { %1442 = vmatmul.mubr.f32.gmra.mrb[104].mxu1 %v873_v54  ;;  %v875_v61 = vmax.f32 %v705_v55, 0.0 }
 0x1c1   :  { %v876_v59 = vmax.f32 %v707_v57, 0.0  ;;  %v710_v60 = vpop.f32.mrb[108].mxu0 }
 0x1c2   :  { %v711_v62 = vadd.f32 %v710_v60, %v3561_v52  ;;  %v712_v63 = vpop.f32.mrb[109].mxu0 }
 0x1c3   :  { %v1183_v0 = vpop.f32.mrb[0].mxu1  ;;  %v713_v1 = vadd.f32 %v712_v63, %v3564_v53  ;;  %2553 = vmatprep.mubr.msk.f32.mxu1 %vm924_vm1, %v876_v59 }
 0x1c4   :  { %v1184_v2 = vadd.f32 %v3833_v58, %v1183_v0  ;;  %v1185_v3 = vpop.f32.mrb[1].mxu1  ;;  %1447 = vmatmul.mubr.f32.gmra.mrb[106].mxu1 %v875_v61  ;;  %v877_v7 = vmax.f32 %v711_v62, 0.0 }
 0x1c5   :  { %v878_v4 = vmax.f32 %v713_v1, 0.0  ;;  %v716_v5 = vpop.f32.mrb[110].mxu0 }
 0x1c6   :  { %v1502_v6 = vmax.f32 %v1184_v2, 0.0  ;;  %v717_v9 = vadd.f32 %v716_v5, %v3561_v52  ;;  %v718_v10 = vpop.f32.mrb[111].mxu0 }
 0x1c7   :  { %v1188_v11 = vpop.f32.mrb[2].mxu1  ;;  %v719_v12 = vadd.f32 %v718_v10, %v3564_v53  ;;  %2554 = vmatprep.mubr.msk.f32.mxu1 %vm924_vm1, %v878_v4 }
 0x1c8   :  { %v1189_v13 = vadd.f32 %v3833_v58, %v1188_v11  ;;  %v1190_v14 = vpop.f32.mrb[3].mxu1  ;;  %2811 = vmatprep.mubr.f32.mxu0 %v1502_v6  ;;  %1452 = vmatmul.mubr.f32.gmra.mrb[108].mxu1 %v877_v7  ;;  %v879_v18 = vmax.f32 %v717_v9, 0.0 }
 0x1c9   :  { %v880_v15 = vmax.f32 %v719_v12, 0.0  ;;  %v722_v16 = vpop.f32.mrb[112].mxu0 }
 0x1ca   :  { %v1503_v17 = vmax.f32 %v1189_v13, 0.0  ;;  %v723_v19 = vadd.f32 %v722_v16, %v3561_v52  ;;  %v724_v20 = vpop.f32.mrb[113].mxu0 }
 0x1cb   :  { %v1193_v21 = vpop.f32.mrb[4].mxu1  ;;  %v725_v22 = vadd.f32 %v724_v20, %v3564_v53  ;;  %2555 = vmatprep.mubr.msk.f32.mxu1 %vm924_vm1, %v880_v15 }
 0x1cc   :  { %v1194_v23 = vadd.f32 %v3833_v58, %v1193_v21  ;;  %v1195_v24 = vpop.f32.mrb[5].mxu1  ;;  %2812 = vmatmul.mubr.f32.vlgmr.msra.gmra.mrb[128].mxu0 %v1503_v17  ;;  %1457 = vmatmul.mubr.f32.gmra.mrb[110].mxu1 %v879_v18  ;;  %v881_v27 = vmax.f32 %v723_v19, 0.0 }
 0x1cd   :  { %v882_v25 = vmax.f32 %v725_v22, 0.0  ;;  %v728_v26 = vpop.f32.mrb[114].mxu0 }
 0x1ce   :  { %v1504_v8 = vmax.f32 %v1194_v23, 0.0  ;;  %v729_v28 = vadd.f32 %v728_v26, %v3561_v52  ;;  %v730_v29 = vpop.f32.mrb[115].mxu0 }
 0x1cf   :  { %v1198_v30 = vpop.f32.mrb[6].mxu1  ;;  %v731_v31 = vadd.f32 %v730_v29, %v3564_v53  ;;  %2556 = vmatprep.mubr.msk.f32.mxu1 %vm924_vm1, %v882_v25 }
 0x1d0   :  { %v1199_v32 = vadd.f32 %v3833_v58, %v1198_v30  ;;  %v1200_v33 = vpop.f32.mrb[7].mxu1  ;;  %2814 = vmatprep.mubr.f32.mxu0 %v1504_v8  ;;  %1462 = vmatmul.mubr.f32.gmra.mrb[112].mxu1 %v881_v27  ;;  %v883_v37 = vmax.f32 %v729_v28, 0.0 }
 0x1d1   :  { %v884_v34 = vmax.f32 %v731_v31, 0.0  ;;  %v734_v35 = vpop.f32.mrb[116].mxu0 }
 0x1d2   :  { %v1505_v36 = vmax.f32 %v1199_v32, 0.0  ;;  %v735_v38 = vadd.f32 %v734_v35, %v3561_v52  ;;  %v736_v39 = vpop.f32.mrb[117].mxu0 }
 0x1d3   :  { %v1203_v40 = vpop.f32.mrb[8].mxu1  ;;  %v737_v41 = vadd.f32 %v736_v39, %v3564_v53  ;;  %2557 = vmatprep.mubr.msk.f32.mxu1 %vm924_vm1, %v884_v34 }
 0x1d4   :  { %v1204_v42 = vadd.f32 %v3833_v58, %v1203_v40  ;;  %v1205_v43 = vpop.f32.mrb[9].mxu1  ;;  %2815 = vmatmul.mubr.f32.gmra.mrb[130].mxu0 %v1505_v36  ;;  %1467 = vmatmul.mubr.f32.gmra.mrb[114].mxu1 %v883_v37  ;;  %v885_v50 = vmax.f32 %v735_v38, 0.0 }
 0x1d5   :  { %v886_v45 = vmax.f32 %v737_v41, 0.0  ;;  %v740_v47 = vpop.f32.mrb[118].mxu0 }
 0x1d6   :  { %v1506_v49 = vmax.f32 %v1204_v42, 0.0  ;;  %v741_v51 = vadd.f32 %v740_v47, %v3561_v52  ;;  %v742_v54 = vpop.f32.mrb[119].mxu0 }
 0x1d7   :  { %v1208_v55 = vpop.f32.mrb[10].mxu1  ;;  %v743_v56 = vadd.f32 %v742_v54, %v3564_v53  ;;  %2558 = vmatprep.mubr.msk.f32.mxu1 %vm924_vm1, %v886_v45 }
 0x1d8   :  { %v1209_v57 = vadd.f32 %v3833_v58, %v1208_v55  ;;  %v1210_v59 = vpop.f32.mrb[11].mxu1  ;;  %2817 = vmatprep.mubr.f32.mxu0 %v1506_v49  ;;  %1472 = vmatmul.mubr.f32.gmra.mrb[116].mxu1 %v885_v50  ;;  %v887_v63 = vmax.f32 %v741_v51, 0.0 }
 0x1d9   :  { %v888_v60 = vmax.f32 %v743_v56, 0.0  ;;  %v746_v61 = vpop.f32.mrb[120].mxu0 }
 0x1da   :  { %v1507_v62 = vmax.f32 %v1209_v57, 0.0  ;;  %v747_v0 = vadd.f32 %v746_v61, %v3561_v52  ;;  %v748_v1 = vpop.f32.mrb[121].mxu0 }
 0x1db   :  { %v1213_v2 = vpop.f32.mrb[12].mxu1  ;;  %v749_v3 = vadd.f32 %v748_v1, %v3564_v53  ;;  %2559 = vmatprep.mubr.msk.f32.mxu1 %vm924_vm1, %v888_v60 }
 0x1dc   :  { %v1214_v4 = vadd.f32 %v3833_v58, %v1213_v2  ;;  %v1215_v5 = vpop.f32.mrb[13].mxu1  ;;  %2818 = vmatmul.mubr.f32.gmra.mrb[132].mxu0 %v1507_v62  ;;  %1477 = vmatmul.mubr.f32.gmra.mrb[118].mxu1 %v887_v63  ;;  %v889_v10 = vmax.f32 %v747_v0, 0.0 }
 0x1dd   :  { %v890_v6 = vmax.f32 %v749_v3, 0.0  ;;  %v752_v7 = vpop.f32.mrb[122].mxu0 }
 0x1de   :  { %v1508_v9 = vmax.f32 %v1214_v4, 0.0  ;;  %v753_v11 = vadd.f32 %v752_v7, %v3561_v52  ;;  %v754_v12 = vpop.f32.mrb[123].mxu0 }
 0x1df   :  { %v1218_v13 = vpop.f32.mrb[14].mxu1  ;;  %v755_v14 = vadd.f32 %v754_v12, %v3564_v53  ;;  %2560 = vmatprep.mubr.msk.f32.mxu1 %vm924_vm1, %v890_v6 }
 0x1e0   :  { %v1219_v15 = vadd.f32 %v3833_v58, %v1218_v13  ;;  %v1220_v16 = vpop.f32.mrb[15].mxu1  ;;  %2820 = vmatprep.mubr.f32.mxu0 %v1508_v9  ;;  %1482 = vmatmul.mubr.f32.gmra.mrb[120].mxu1 %v889_v10  ;;  %v891_v20 = vmax.f32 %v753_v11, 0.0 }
 0x1e1   :  { %v892_v17 = vmax.f32 %v755_v14, 0.0  ;;  %v758_v18 = vpop.f32.mrb[124].mxu0 }
 0x1e2   :  { %v1509_v19 = vmax.f32 %v1219_v15, 0.0  ;;  %v759_v21 = vadd.f32 %v758_v18, %v3561_v52  ;;  %v760_v22 = vpop.f32.mrb[125].mxu0 }
 0x1e3   :  { %v1223_v23 = vpop.f32.mrb[16].mxu1  ;;  %v761_v24 = vadd.f32 %v760_v22, %v3564_v53  ;;  %2561 = vmatprep.mubr.msk.f32.mxu1 %vm924_vm1, %v892_v17 }
 0x1e4   :  { %v1224_v25 = vadd.f32 %v3833_v58, %v1223_v23  ;;  %v1225_v26 = vpop.f32.mrb[17].mxu1  ;;  %2821 = vmatmul.mubr.f32.gmra.mrb[134].mxu0 %v1509_v19  ;;  %1487 = vmatmul.mubr.f32.gmra.mrb[122].mxu1 %v891_v20  ;;  %v893_v29 = vmax.f32 %v759_v21, 0.0 }
 0x1e5   :  { %v894_v8 = vmax.f32 %v761_v24, 0.0  ;;  %v764_v27 = vpop.f32.mrb[126].mxu0 }
 0x1e6   :  { %v1510_v28 = vmax.f32 %v1224_v25, 0.0  ;;  %v765_v30 = vadd.f32 %v764_v27, %v3561_v52  ;;  %v766_v31 = vpop.f32.mrb[127].mxu0 }
 0x1e7   :  { %v1228_v32 = vpop.f32.mrb[18].mxu1  ;;  %v767_v33 = vadd.f32 %v766_v31, %v3564_v53  ;;  %2562 = vmatprep.mubr.msk.f32.mxu1 %vm924_vm1, %v894_v8 }
 0x1e8   :  { %v1229_v34 = vadd.f32 %v3833_v58, %v1228_v32  ;;  %v1230_v35 = vpop.f32.mrb[19].mxu1  ;;  %2823 = vmatprep.mubr.f32.mxu0 %v1510_v28  ;;  %1492 = vmatmul.mubr.f32.gmra.mrb[124].mxu1 %v893_v29  ;;  %v895_v38 = vmax.f32 %v765_v30, 0.0 }
 0x1e9   :  { %v896_v36 = vmax.f32 %v767_v33, 0.0 }
 0x1ea   :  { %v1511_v37 = vmax.f32 %v1229_v34, 0.0 }
 0x1eb   :  { %v1233_v39 = vpop.f32.mrb[20].mxu1  ;;  %2563 = vmatprep.mubr.msk.f32.mxu1 %vm924_vm1, %v896_v36 }
 0x1ec   :  { %v1234_v40 = vadd.f32 %v3833_v58, %v1233_v39  ;;  %v1235_v52 = vpop.f32.mrb[21].mxu1  ;;  %2824 = vmatmul.mubr.f32.gmra.mrb[136].mxu0 %v1511_v37  ;;  %1497 = vmatmul.mubr.f32.gmra.mrb[126].mxu1 %v895_v38 }
 0x1ee   :  { %v1512_v41 = vmax.f32 %v1234_v40, 0.0 }
 0x1ef   :  { %v1238_v53 = vpop.f32.mrb[22].mxu1 }
 0x1f0   :  { %v1239_v42 = vadd.f32 %v3833_v58, %v1238_v53  ;;  %v1240_v43 = vpop.f32.mrb[23].mxu1  ;;  %2826 = vmatprep.mubr.f32.mxu0 %v1512_v41 }
 0x1f2   :  { %v1513_v45 = vmax.f32 %v1239_v42, 0.0 }
 0x1f3   :  { %v1243_v47 = vpop.f32.mrb[24].mxu1 }
 0x1f4   :  { %v1244_v49 = vadd.f32 %v3833_v58, %v1243_v47  ;;  %v1245_v50 = vpop.f32.mrb[25].mxu1  ;;  %2827 = vmatmul.mubr.f32.gmra.mrb[138].mxu0 %v1513_v45 }
 0x1f6   :  { %v1514_v51 = vmax.f32 %v1244_v49, 0.0 }
 0x1f7   :  { %v1248_v54 = vpop.f32.mrb[26].mxu1 }
 0x1f8   :  { %v1249_v55 = vadd.f32 %v3833_v58, %v1248_v54  ;;  %v1250_v56 = vpop.f32.mrb[27].mxu1  ;;  %2829 = vmatprep.mubr.f32.mxu0 %v1514_v51 }
 0x1fa   :  { %v1515_v57 = vmax.f32 %v1249_v55, 0.0 }
 0x1fb   :  { %v1253_v59 = vpop.f32.mrb[28].mxu1 }
 0x1fc   :  { %v1254_v60 = vadd.f32 %v3833_v58, %v1253_v59  ;;  %v1255_v61 = vpop.f32.mrb[29].mxu1  ;;  %2830 = vmatmul.mubr.f32.gmra.mrb[140].mxu0 %v1515_v57 }
 0x1fe   :  { %v1516_v62 = vmax.f32 %v1254_v60, 0.0 }
 0x1ff   :  { %v1258_v63 = vpop.f32.mrb[30].mxu1 }
 0x200   :  { %v1259_v0 = vadd.f32 %v3833_v58, %v1258_v63  ;;  %v1260_v1 = vpop.f32.mrb[31].mxu1  ;;  %2832 = vmatprep.mubr.f32.mxu0 %v1516_v62 }
 0x202   :  { %v1517_v2 = vmax.f32 %v1259_v0, 0.0 }
 0x203   :  { %v1263_v3 = vpop.f32.mrb[32].mxu1 }
 0x204   :  { %v1264_v4 = vadd.f32 %v3833_v58, %v1263_v3  ;;  %v1265_v5 = vpop.f32.mrb[33].mxu1  ;;  %2833 = vmatmul.mubr.f32.gmra.mrb[142].mxu0 %v1517_v2 }
 0x206   :  { %v1518_v6 = vmax.f32 %v1264_v4, 0.0 }
 0x207   :  { %v1268_v7 = vpop.f32.mrb[34].mxu1 }
 0x208   :  { %v1269_v9 = vadd.f32 %v3833_v58, %v1268_v7  ;;  %v1270_v10 = vpop.f32.mrb[35].mxu1  ;;  %2835 = vmatprep.mubr.f32.mxu0 %v1518_v6 }
 0x20a   :  { %v1519_v11 = vmax.f32 %v1269_v9, 0.0 }
 0x20b   :  { %v1273_v12 = vpop.f32.mrb[36].mxu1 }
 0x20c   :  { %2836 = vmatmul.mubr.f32.gmra.mrb[144].mxu0 %v1519_v11  ;;  %v1274_v13 = vadd.f32 %v3833_v58, %v1273_v12  ;;  %v1275_v14 = vpop.f32.mrb[37].mxu1 }
 0x20e   :  { %v1520_v15 = vmax.f32 %v1274_v13, 0.0 }
 0x20f   :  { %v1278_v16 = vpop.f32.mrb[38].mxu1 }
 0x210   :  { %v1279_v17 = vadd.f32 %v3833_v58, %v1278_v16  ;;  %2838 = vmatprep.mubr.f32.mxu0 %v1520_v15  ;;  %v1280_v18 = vpop.f32.mrb[39].mxu1 }
 0x212   :  { %v1521_v19 = vmax.f32 %v1279_v17, 0.0 }
 0x213   :  { %v1283_v20 = vpop.f32.mrb[40].mxu1 }
 0x214   :  { %2839 = vmatmul.mubr.f32.gmra.mrb[146].mxu0 %v1521_v19  ;;  %v1284_v21 = vadd.f32 %v3833_v58, %v1283_v20  ;;  %v1285_v22 = vpop.f32.mrb[41].mxu1 }
 0x216   :  { %v1522_v23 = vmax.f32 %v1284_v21, 0.0 }
 0x217   :  { %v1288_v24 = vpop.f32.mrb[42].mxu1 }
 0x218   :  { %v1289_v25 = vadd.f32 %v3833_v58, %v1288_v24  ;;  %2841 = vmatprep.mubr.f32.mxu0 %v1522_v23  ;;  %v1290_v26 = vpop.f32.mrb[43].mxu1 }
 0x21a   :  { %v1523_v8 = vmax.f32 %v1289_v25, 0.0 }
 0x21b   :  { %v1293_v27 = vpop.f32.mrb[44].mxu1 }
 0x21c   :  { %2842 = vmatmul.mubr.f32.gmra.mrb[148].mxu0 %v1523_v8  ;;  %v1294_v28 = vadd.f32 %v3833_v58, %v1293_v27  ;;  %v1295_v29 = vpop.f32.mrb[45].mxu1 }
 0x21e   :  { %v1524_v30 = vmax.f32 %v1294_v28, 0.0 }
 0x21f   :  { %v1298_v31 = vpop.f32.mrb[46].mxu1 }
 0x220   :  { %v1299_v32 = vadd.f32 %v3833_v58, %v1298_v31  ;;  %2844 = vmatprep.mubr.f32.mxu0 %v1524_v30  ;;  %v1300_v33 = vpop.f32.mrb[47].mxu1 }
 0x222   :  { %v1525_v34 = vmax.f32 %v1299_v32, 0.0 }
 0x223   :  { %v1303_v35 = vpop.f32.mrb[48].mxu1 }
 0x224   :  { %2845 = vmatmul.mubr.f32.gmra.mrb[150].mxu0 %v1525_v34  ;;  %v1304_v36 = vadd.f32 %v3833_v58, %v1303_v35  ;;  %v1305_v37 = vpop.f32.mrb[49].mxu1 }
 0x226   :  { %v1526_v38 = vmax.f32 %v1304_v36, 0.0 }
 0x227   :  { %v1308_v39 = vpop.f32.mrb[50].mxu1 }
 0x228   :  { %v1309_v40 = vadd.f32 %v3833_v58, %v1308_v39  ;;  %2847 = vmatprep.mubr.f32.mxu0 %v1526_v38  ;;  %v1310_v52 = vpop.f32.mrb[51].mxu1 }
 0x22a   :  { %v1527_v41 = vmax.f32 %v1309_v40, 0.0 }
 0x22b   :  { %v1313_v53 = vpop.f32.mrb[52].mxu1 }
 0x22c   :  { %2848 = vmatmul.mubr.f32.gmra.mrb[152].mxu0 %v1527_v41  ;;  %v1314_v42 = vadd.f32 %v3833_v58, %v1313_v53  ;;  %v1315_v43 = vpop.f32.mrb[53].mxu1 }
 0x22e   :  { %v1528_v45 = vmax.f32 %v1314_v42, 0.0 }
 0x22f   :  { %v1318_v47 = vpop.f32.mrb[54].mxu1 }
 0x230   :  { %v1319_v49 = vadd.f32 %v3833_v58, %v1318_v47  ;;  %2850 = vmatprep.mubr.f32.mxu0 %v1528_v45  ;;  %v1320_v50 = vpop.f32.mrb[55].mxu1 }
 0x232   :  { %v1529_v51 = vmax.f32 %v1319_v49, 0.0 }
 0x233   :  { %v1323_v54 = vpop.f32.mrb[56].mxu1 }
 0x234   :  { %2851 = vmatmul.mubr.f32.gmra.mrb[154].mxu0 %v1529_v51  ;;  %v1324_v55 = vadd.f32 %v3833_v58, %v1323_v54  ;;  %v1325_v56 = vpop.f32.mrb[57].mxu1 }
 0x236   :  { %v1530_v57 = vmax.f32 %v1324_v55, 0.0 }
 0x237   :  { %v1328_v59 = vpop.f32.mrb[58].mxu1 }
 0x238   :  { %v1329_v60 = vadd.f32 %v3833_v58, %v1328_v59  ;;  %2853 = vmatprep.mubr.f32.mxu0 %v1530_v57  ;;  %v1330_v61 = vpop.f32.mrb[59].mxu1 }
 0x23a   :  { %v1531_v62 = vmax.f32 %v1329_v60, 0.0 }
 0x23b   :  { %v1333_v63 = vpop.f32.mrb[60].mxu1 }
 0x23c   :  { %2854 = vmatmul.mubr.f32.gmra.mrb[156].mxu0 %v1531_v62  ;;  %v1334_v0 = vadd.f32 %v3833_v58, %v1333_v63  ;;  %v1335_v1 = vpop.f32.mrb[61].mxu1 }
 0x23e   :  { %v1532_v2 = vmax.f32 %v1334_v0, 0.0 }
 0x23f   :  { %v1338_v3 = vpop.f32.mrb[62].mxu1 }
 0x240   :  { %v1339_v4 = vadd.f32 %v3833_v58, %v1338_v3  ;;  %2856 = vmatprep.mubr.f32.mxu0 %v1532_v2  ;;  %v1340_v5 = vpop.f32.mrb[63].mxu1 }
 0x242   :  { %v1533_v6 = vmax.f32 %v1339_v4, 0.0 }
 0x243   :  { %v1343_v7 = vpop.f32.mrb[64].mxu1 }
 0x244   :  { %2857 = vmatmul.mubr.f32.gmra.mrb[158].mxu0 %v1533_v6  ;;  %v1344_v9 = vadd.f32 %v3833_v58, %v1343_v7  ;;  %v1345_v10 = vpop.f32.mrb[65].mxu1 }
 0x246   :  { %v1534_v11 = vmax.f32 %v1344_v9, 0.0 }
 0x247   :  { %v1348_v12 = vpop.f32.mrb[66].mxu1 }
 0x248   :  { %v1349_v13 = vadd.f32 %v3833_v58, %v1348_v12  ;;  %v1350_v14 = vpop.f32.mrb[67].mxu1  ;;  %2859 = vmatprep.mubr.f32.mxu0 %v1534_v11 }
 0x24a   :  { %v1535_v15 = vmax.f32 %v1349_v13, 0.0 }
 0x24b   :  { %v1353_v16 = vpop.f32.mrb[68].mxu1 }
 0x24c   :  { %v1354_v17 = vadd.f32 %v3833_v58, %v1353_v16  ;;  %v1355_v18 = vpop.f32.mrb[69].mxu1  ;;  %2860 = vmatmul.mubr.f32.gmra.mrb[160].mxu0 %v1535_v15 }
 0x24e   :  { %v1536_v19 = vmax.f32 %v1354_v17, 0.0 }
 0x24f   :  { %v1358_v20 = vpop.f32.mrb[70].mxu1 }
 0x250   :  { %v1359_v21 = vadd.f32 %v3833_v58, %v1358_v20  ;;  %v1360_v22 = vpop.f32.mrb[71].mxu1  ;;  %2862 = vmatprep.mubr.f32.mxu0 %v1536_v19 }
 0x252   :  { %v1537_v23 = vmax.f32 %v1359_v21, 0.0 }
 0x253   :  { %v1363_v24 = vpop.f32.mrb[72].mxu1 }
 0x254   :  { %v1364_v25 = vadd.f32 %v3833_v58, %v1363_v24  ;;  %v1365_v26 = vpop.f32.mrb[73].mxu1  ;;  %2863 = vmatmul.mubr.f32.gmra.mrb[162].mxu0 %v1537_v23 }
 0x256   :  { %v1538_v8 = vmax.f32 %v1364_v25, 0.0 }
 0x257   :  { %v1368_v27 = vpop.f32.mrb[74].mxu1 }
 0x258   :  { %v1369_v28 = vadd.f32 %v3833_v58, %v1368_v27  ;;  %v1370_v29 = vpop.f32.mrb[75].mxu1  ;;  %2865 = vmatprep.mubr.f32.mxu0 %v1538_v8 }
 0x25a   :  { %v1539_v30 = vmax.f32 %v1369_v28, 0.0 }
 0x25b   :  { %v1373_v31 = vpop.f32.mrb[76].mxu1 }
 0x25c   :  { %v1374_v32 = vadd.f32 %v3833_v58, %v1373_v31  ;;  %v1375_v33 = vpop.f32.mrb[77].mxu1  ;;  %2866 = vmatmul.mubr.f32.gmra.mrb[164].mxu0 %v1539_v30 }
 0x25e   :  { %v1540_v34 = vmax.f32 %v1374_v32, 0.0 }
 0x25f   :  { %v1378_v35 = vpop.f32.mrb[78].mxu1 }
 0x260   :  { %v1379_v36 = vadd.f32 %v3833_v58, %v1378_v35  ;;  %v1380_v37 = vpop.f32.mrb[79].mxu1  ;;  %2868 = vmatprep.mubr.f32.mxu0 %v1540_v34 }
 0x262   :  { %v1541_v38 = vmax.f32 %v1379_v36, 0.0 }
 0x263   :  { %v1383_v39 = vpop.f32.mrb[80].mxu1 }
 0x264   :  { %v1384_v40 = vadd.f32 %v3833_v58, %v1383_v39  ;;  %v1385_v52 = vpop.f32.mrb[81].mxu1  ;;  %2869 = vmatmul.mubr.f32.gmra.mrb[166].mxu0 %v1541_v38  ;;  %v3924_v38 = vld [vmem:[%s4152_s6] ss:$0 sm:$0xff] }
 0x266   :  { %v1542_v41 = vmax.f32 %v1384_v40, 0.0 }
 0x267   :  { %v1388_v53 = vpop.f32.mrb[82].mxu1 }
 0x268   :  { %v1389_v42 = vadd.f32 %v3833_v58, %v1388_v53  ;;  %v1390_v43 = vpop.f32.mrb[83].mxu1  ;;  %2871 = vmatprep.mubr.f32.mxu0 %v1542_v41 }
 0x26a   :  { %v1543_v45 = vmax.f32 %v1389_v42, 0.0 }
 0x26b   :  { %v1393_v47 = vpop.f32.mrb[84].mxu1 }
 0x26c   :  { %v1394_v49 = vadd.f32 %v3833_v58, %v1393_v47  ;;  %v1395_v50 = vpop.f32.mrb[85].mxu1  ;;  %2872 = vmatmul.mubr.f32.gmra.mrb[168].mxu0 %v1543_v45 }
 0x26e   :  { %v1544_v51 = vmax.f32 %v1394_v49, 0.0 }
 0x26f   :  { %v1398_v54 = vpop.f32.mrb[86].mxu1 }
 0x270   :  { %v1399_v55 = vadd.f32 %v3833_v58, %v1398_v54  ;;  %v1400_v56 = vpop.f32.mrb[87].mxu1  ;;  %2874 = vmatprep.mubr.f32.mxu0 %v1544_v51 }
 0x272   :  { %v1545_v57 = vmax.f32 %v1399_v55, 0.0 }
 0x273   :  { %v1403_v59 = vpop.f32.mrb[88].mxu1 }
 0x274   :  { %v1404_v60 = vadd.f32 %v3833_v58, %v1403_v59  ;;  %v1405_v61 = vpop.f32.mrb[89].mxu1  ;;  %2875 = vmatmul.mubr.f32.gmra.mrb[170].mxu0 %v1545_v57 }
 0x276   :  { %v1546_v62 = vmax.f32 %v1404_v60, 0.0 }
 0x277   :  { %v1408_v63 = vpop.f32.mrb[90].mxu1 }
 0x278   :  { %v1409_v0 = vadd.f32 %v3833_v58, %v1408_v63  ;;  %v1410_v1 = vpop.f32.mrb[91].mxu1  ;;  %2877 = vmatprep.mubr.f32.mxu0 %v1546_v62 }
 0x27a   :  { %v1547_v2 = vmax.f32 %v1409_v0, 0.0 }
 0x27b   :  { %v1413_v3 = vpop.f32.mrb[92].mxu1 }
 0x27c   :  { %v1414_v4 = vadd.f32 %v3833_v58, %v1413_v3  ;;  %v1415_v5 = vpop.f32.mrb[93].mxu1  ;;  %2878 = vmatmul.mubr.f32.gmra.mrb[172].mxu0 %v1547_v2 }
 0x27e   :  { %v1548_v6 = vmax.f32 %v1414_v4, 0.0 }
 0x27f   :  { %v1418_v7 = vpop.f32.mrb[94].mxu1 }
 0x280   :  { %v1419_v9 = vadd.f32 %v3833_v58, %v1418_v7  ;;  %v1420_v10 = vpop.f32.mrb[95].mxu1  ;;  %2880 = vmatprep.mubr.f32.mxu0 %v1548_v6 }
 0x282   :  { %v1549_v11 = vmax.f32 %v1419_v9, 0.0 }
 0x283   :  { %v1423_v12 = vpop.f32.mrb[96].mxu1 }
 0x284   :  { %v1424_v13 = vadd.f32 %v3833_v58, %v1423_v12  ;;  %v1425_v14 = vpop.f32.mrb[97].mxu1  ;;  %2881 = vmatmul.mubr.f32.gmra.mrb[174].mxu0 %v1549_v11 }
 0x286   :  { %v1550_v15 = vmax.f32 %v1424_v13, 0.0 }
 0x287   :  { %v1428_v16 = vpop.f32.mrb[98].mxu1 }
 0x288   :  { %v1429_v17 = vadd.f32 %v3833_v58, %v1428_v16  ;;  %2883 = vmatprep.mubr.f32.mxu0 %v1550_v15  ;;  %v1430_v18 = vpop.f32.mrb[99].mxu1 }
 0x28a   :  { %v1551_v19 = vmax.f32 %v1429_v17, 0.0 }
 0x28b   :  { %v1433_v20 = vpop.f32.mrb[100].mxu1 }
 0x28c   :  { %2884 = vmatmul.mubr.f32.gmra.mrb[176].mxu0 %v1551_v19  ;;  %v1434_v21 = vadd.f32 %v3833_v58, %v1433_v20  ;;  %v1435_v22 = vpop.f32.mrb[101].mxu1 }
 0x28e   :  { %v1552_v23 = vmax.f32 %v1434_v21, 0.0 }
 0x28f   :  { %v1438_v24 = vpop.f32.mrb[102].mxu1 }
 0x290   :  { %v1439_v25 = vadd.f32 %v3833_v58, %v1438_v24  ;;  %2886 = vmatprep.mubr.f32.mxu0 %v1552_v23  ;;  %v1440_v26 = vpop.f32.mrb[103].mxu1 }
 0x292   :  { %v1553_v8 = vmax.f32 %v1439_v25, 0.0 }
 0x293   :  { %v1443_v27 = vpop.f32.mrb[104].mxu1 }
 0x294   :  { %2887 = vmatmul.mubr.f32.gmra.mrb[178].mxu0 %v1553_v8  ;;  %v1444_v28 = vadd.f32 %v3833_v58, %v1443_v27  ;;  %v1445_v29 = vpop.f32.mrb[105].mxu1 }
 0x296   :  { %v1554_v30 = vmax.f32 %v1444_v28, 0.0 }
 0x297   :  { %v1448_v31 = vpop.f32.mrb[106].mxu1 }
 0x298   :  { %v1449_v32 = vadd.f32 %v3833_v58, %v1448_v31  ;;  %2889 = vmatprep.mubr.f32.mxu0 %v1554_v30  ;;  %v1450_v33 = vpop.f32.mrb[107].mxu1 }
 0x29a   :  { %v1555_v34 = vmax.f32 %v1449_v32, 0.0 }
 0x29b   :  { %v1453_v35 = vpop.f32.mrb[108].mxu1 }
 0x29c   :  { %2890 = vmatmul.mubr.f32.gmra.mrb[180].mxu0 %v1555_v34  ;;  %v1454_v36 = vadd.f32 %v3833_v58, %v1453_v35  ;;  %v1455_v37 = vpop.f32.mrb[109].mxu1 }
 0x29e   :  { %v1556_v39 = vmax.f32 %v1454_v36, 0.0 }
 0x29f   :  { %v2813_v40 = vpop.f32.mrb[128].mxu0  ;;  %v1458_v52 = vpop.f32.mrb[110].mxu1 }
 0x2a0   :  { %v1661_v41 = vadd.f32 %v2813_v40, %v3924_v38  ;;  %v1655_v53 = vpop.f32.mrb[129].mxu0  ;;  %v1459_v42 = vadd.f32 %v3833_v58, %v1458_v52  ;;  %2892 = vmatprep.mubr.f32.mxu0 %v1556_v39  ;;  %v1460_v43 = vpop.f32.mrb[111].mxu1 }
 0x2a1   :  { %v1656_v45 = vadd.f32 %v3924_v38, %v1655_v53 }
 0x2a2   :  { %v1975_v47 = vmax.f32 %v1661_v41, 0.0  ;;  %v1557_v49 = vmax.f32 %v1459_v42, 0.0 }
 0x2a3   :  { %v1974_v50 = vmax.f32 %v1656_v45, 0.0  ;;  %v1463_v51 = vpop.f32.mrb[112].mxu1 }
 0x2a4   :  { %2893 = vmatmul.mubr.f32.gmra.mrb[182].mxu0 %v1557_v49  ;;  %v1464_v54 = vadd.f32 %v3833_v58, %v1463_v51  ;;  %v1465_v55 = vpop.f32.mrb[113].mxu1 }
 0x2a5   :  { %v3930_v56 = vpack.c.bf16 %v1975_v47, %v1974_v50 }
 0x2a6   :  { %v1558_v57 = vmax.f32 %v1464_v54, 0.0 }
 0x2a7   :  { %v2816_v59 = vpop.f32.mrb[130].mxu0  ;;  %v1468_v60 = vpop.f32.mrb[114].mxu1 }
 0x2a8   :  { %v1671_v61 = vadd.f32 %v2816_v59, %v3924_v38  ;;  %v1665_v62 = vpop.f32.mrb[131].mxu0  ;;  %v1469_v63 = vadd.f32 %v3833_v58, %v1468_v60  ;;  %2895 = vmatprep.mubr.f32.mxu0 %v1558_v57  ;;  %v1470_v0 = vpop.f32.mrb[115].mxu1 }
 0x2a9   :  { %v1666_v1 = vadd.f32 %v3924_v38, %v1665_v62 }
 0x2aa   :  { %v1977_v2 = vmax.f32 %v1671_v61, 0.0  ;;  %v1559_v3 = vmax.f32 %v1469_v63, 0.0 }
 0x2ab   :  { %v1976_v4 = vmax.f32 %v1666_v1, 0.0  ;;  %v1473_v5 = vpop.f32.mrb[116].mxu1 }
 0x2ac   :  { %2896 = vmatmul.mubr.f32.gmra.mrb[184].mxu0 %v1559_v3  ;;  %v1474_v6 = vadd.f32 %v3833_v58, %v1473_v5  ;;  %v1475_v7 = vpop.f32.mrb[117].mxu1 }
 0x2ad   :  { %v3936_v9 = vpack.c.bf16 %v1977_v2, %v1976_v4 }
 0x2ae   :  { %v1560_v10 = vmax.f32 %v1474_v6, 0.0 }
 0x2af   :  { %v2819_v11 = vpop.f32.mrb[132].mxu0  ;;  %v1478_v12 = vpop.f32.mrb[118].mxu1 }
 0x2b0   :  { %v1681_v13 = vadd.f32 %v2819_v11, %v3924_v38  ;;  %v1675_v14 = vpop.f32.mrb[133].mxu0  ;;  %v1479_v15 = vadd.f32 %v3833_v58, %v1478_v12  ;;  %2898 = vmatprep.mubr.f32.mxu0 %v1560_v10  ;;  %v1480_v16 = vpop.f32.mrb[119].mxu1 }
 0x2b1   :  { %v1676_v17 = vadd.f32 %v3924_v38, %v1675_v14 }
 0x2b2   :  { %v1979_v18 = vmax.f32 %v1681_v13, 0.0  ;;  %v1561_v19 = vmax.f32 %v1479_v15, 0.0 }
 0x2b3   :  { %v1978_v20 = vmax.f32 %v1676_v17, 0.0  ;;  %v1483_v21 = vpop.f32.mrb[120].mxu1 }
 0x2b4   :  { %2899 = vmatmul.mubr.f32.gmra.mrb[186].mxu0 %v1561_v19  ;;  %v1484_v22 = vadd.f32 %v3833_v58, %v1483_v21  ;;  %v1485_v23 = vpop.f32.mrb[121].mxu1 }
 0x2b5   :  { %v3942_v24 = vpack.c.bf16 %v1979_v18, %v1978_v20  ;;  %v3978_v23 = vld [vmem:[%s4153_s7] sm:$0x1]  ;;  %s3115_s7 = smov [#allocation3]  }
 0x2b6   :  { %v1562_v25 = vmax.f32 %v1484_v22, 0.0  ;;  %2743 = vmatprep.mubr.msk.f32.mxu1 %vm2049_vm2, %v3978_v23  ;;  %s2427_s10 = sshll.u32 %s3115_s7, 4  ;;  %s2428_s10 = int_to_ptr.vmem [resolvable:$true] %s2427_s10 }
 0x2b7   :  { %v2822_v26 = vpop.f32.mrb[134].mxu0  ;;  %v1488_v8 = vpop.f32.mrb[122].mxu1  ;;  %s3087_s11 = scalar_lea.vmem %s2428_s10, 64  ;;  %p3092_p1 = scmp.lt.s32.totalorder %s2428_s10, %s2428_s10 }
 0x2b8   :  { %v1691_v27 = vadd.f32 %v2822_v26, %v3924_v38  ;;  %v1685_v28 = vpop.f32.mrb[135].mxu0  ;;  %v1489_v29 = vadd.f32 %v3833_v58, %v1488_v8  ;;  %2901 = vmatprep.mubr.f32.mxu0 %v1562_v25  ;;  %v1490_v30 = vpop.f32.mrb[123].mxu1  ;;  %p3088_p0 = scmp.ne.s32.totalorder %s2428_s10, %s3087_s11  ;;  %p3093_p2 = scmp.lt.s32.totalorder %s3087_s11, %s3087_s11 }
 0x2b9   :  { %v1686_v31 = vadd.f32 %v3924_v38, %v1685_v28 }
 0x2ba   :  { %v1981_v32 = vmax.f32 %v1691_v27, 0.0  ;;  %v1563_v33 = vmax.f32 %v1489_v29, 0.0  ;;  %p3094_p3 = por %p3093_p2, %p3092_p1 }
 0x2bb   :  { %v1980_v34 = vmax.f32 %v1686_v31, 0.0  ;;  %v1493_v35 = vpop.f32.mrb[124].mxu1 }
 0x2bc   :  { %2902 = vmatmul.mubr.f32.gmra.mrb[188].mxu0 %v1563_v33  ;;  %v1494_v36 = vadd.f32 %v3833_v58, %v1493_v35  ;;  %v1495_v37 = vpop.f32.mrb[125].mxu1  ;;  %p3095_p4 = pnand %p3094_p3, %p3088_p0 }
 0x2bd   :  { %v3948_v39 = vpack.c.bf16 %v1981_v32, %v1980_v34 }
 0x2be   :  { %v1564_v40 = vmax.f32 %v1494_v36, 0.0 }
 0x2bf   :  { %v2825_v52 = vpop.f32.mrb[136].mxu0  ;;  %v1498_v41 = vpop.f32.mrb[126].mxu1 }
 0x2c0   :  { %v1701_v53 = vadd.f32 %v2825_v52, %v3924_v38  ;;  %v1695_v42 = vpop.f32.mrb[137].mxu0  ;;  %v1499_v43 = vadd.f32 %v3833_v58, %v1498_v41  ;;  %2904 = vmatprep.mubr.f32.mxu0 %v1564_v40  ;;  %v1500_v45 = vpop.f32.mrb[127].mxu1 }
 0x2c1   :  { %v1696_v47 = vadd.f32 %v3924_v38, %v1695_v42 }
 0x2c2   :  { %v1983_v49 = vmax.f32 %v1701_v53, 0.0  ;;  %v1565_v50 = vmax.f32 %v1499_v43, 0.0 }
 0x2c3   :  { %v1982_v51 = vmax.f32 %v1696_v47, 0.0 }
 0x2c4   :  { %2905 = vmatmul.mubr.f32.gmra.mrb[190].mxu0 %v1565_v50 }
 0x2c5   :  { %v3953_v54 = vpack.c.bf16 %v1983_v49, %v1982_v51 }
 0x2c7   :  { %v2828_v55 = vpop.f32.mrb[138].mxu0 }
 0x2c8   :  { %v1711_v57 = vadd.f32 %v2828_v55, %v3924_v38  ;;  %v1705_v59 = vpop.f32.mrb[139].mxu0 }
 0x2c9   :  { %v1706_v60 = vadd.f32 %v3924_v38, %v1705_v59 }
 0x2ca   :  { %v1985_v61 = vmax.f32 %v1711_v57, 0.0 }
 0x2cb   :  { %v1984_v62 = vmax.f32 %v1706_v60, 0.0 }
 0x2cd   :  { %v3957_v63 = vpack.c.bf16 %v1985_v61, %v1984_v62 }
 0x2cf   :  { %v2831_v58 = vpop.f32.mrb[140].mxu0 }
 0x2d0   :  { %v1721_v0 = vadd.f32 %v2831_v58, %v3924_v38  ;;  %v1715_v1 = vpop.f32.mrb[141].mxu0 }
 0x2d1   :  { %v1716_v2 = vadd.f32 %v3924_v38, %v1715_v1 }
 0x2d2   :  { %v1987_v3 = vmax.f32 %v1721_v0, 0.0 }
 0x2d3   :  { %v1986_v4 = vmax.f32 %v1716_v2, 0.0 }
 0x2d5   :  { %v3961_v5 = vpack.c.bf16 %v1987_v3, %v1986_v4 }
 0x2d7   :  { %v2834_v6 = vpop.f32.mrb[142].mxu0 }
 0x2d8   :  { %v1731_v7 = vadd.f32 %v2834_v6, %v3924_v38  ;;  %v1725_v10 = vpop.f32.mrb[143].mxu0 }
 0x2d9   :  { %v1726_v11 = vadd.f32 %v3924_v38, %v1725_v10 }
 0x2da   :  { %v1989_v12 = vmax.f32 %v1731_v7, 0.0 }
 0x2db   :  { %v1988_v13 = vmax.f32 %v1726_v11, 0.0 }
 0x2dd   :  { %v3965_v14 = vpack.c.bf16 %v1989_v12, %v1988_v13 }
 0x2df   :  { %v2837_v15 = vpop.f32.mrb[144].mxu0 }
 0x2e0   :  { %v1741_v16 = vadd.f32 %v2837_v15, %v3924_v38  ;;  %v1735_v17 = vpop.f32.mrb[145].mxu0 }
 0x2e1   :  { %v1736_v18 = vadd.f32 %v3924_v38, %v1735_v17 }
 0x2e2   :  { %v1991_v19 = vmax.f32 %v1741_v16, 0.0 }
 0x2e3   :  { %v1990_v20 = vmax.f32 %v1736_v18, 0.0 }
 0x2e5   :  { %v2985_v22 = vpack.c.bf16 %v1991_v19, %v1990_v20 }
 0x2e7   :  { %v2840_v25 = vpop.f32.mrb[146].mxu0  ;;  %2987 = vmatprep.subr.msk.bf16.mxu1 %vm3971_vm3, %v2985_v22 }
 0x2e8   :  { %v1751_v26 = vadd.f32 %v2840_v25, %v3924_v38  ;;  %v1745_v8 = vpop.f32.mrb[147].mxu0  ;;  %2990 = vmatpush3.bf16.xpose.msk.msra.mxu1 %vm3971_vm3, %v3930_v56  ;;  %v2039_v25 = vld [vmem:[#allocation2] sm:$0x1] }
 0x2e9   :  { %v1746_v27 = vadd.f32 %v3924_v38, %v1745_v8 }
 0x2ea   :  { %v1993_v28 = vmax.f32 %v1751_v26, 0.0 }
 0x2eb   :  { %v1992_v29 = vmax.f32 %v1746_v27, 0.0 }
 0x2ed   :  { %v2991_v30 = vpack.c.bf16 %v1993_v28, %v1992_v29 }
 0x2ef   :  { %v2843_v31 = vpop.f32.mrb[148].mxu0  ;;  %2993 = vmatprep.subr.msk.bf16.mxu1 %vm3971_vm3, %v2991_v30 }
 0x2f0   :  { %v1761_v32 = vadd.f32 %v2843_v31, %v3924_v38  ;;  %v1755_v33 = vpop.f32.mrb[149].mxu0  ;;  %2996 = vmatpush3.bf16.xpose.msk.msra.mxu1 %vm3971_vm3, %v3936_v9 }
 0x2f1   :  { %v1756_v34 = vadd.f32 %v3924_v38, %v1755_v33 }
 0x2f2   :  { %v1995_v35 = vmax.f32 %v1761_v32, 0.0 }
 0x2f3   :  { %v1994_v56 = vmax.f32 %v1756_v34, 0.0 }
 0x2f5   :  { %v2997_v36 = vpack.c.bf16 %v1995_v35, %v1994_v56 }
 0x2f7   :  { %v2846_v37 = vpop.f32.mrb[150].mxu0  ;;  %2999 = vmatprep.subr.msk.bf16.mxu1 %vm3971_vm3, %v2997_v36 }
 0x2f8   :  { %v1771_v40 = vadd.f32 %v2846_v37, %v3924_v38  ;;  %v1765_v52 = vpop.f32.mrb[151].mxu0  ;;  %3002 = vmatpush3.bf16.xpose.msk.msra.mxu1 %vm3971_vm3, %v3942_v24 }
 0x2f9   :  { %v1766_v41 = vadd.f32 %v3924_v38, %v1765_v52 }
 0x2fa   :  { %v1997_v53 = vmax.f32 %v1771_v40, 0.0 }
 0x2fb   :  { %v1996_v9 = vmax.f32 %v1766_v41, 0.0 }
 0x2fd   :  { %v3003_v42 = vpack.c.bf16 %v1997_v53, %v1996_v9 }
 0x2ff   :  { %v2849_v43 = vpop.f32.mrb[152].mxu0  ;;  %3005 = vmatprep.subr.msk.bf16.mxu1 %vm3971_vm3, %v3003_v42 }
 0x300   :  { %v1781_v45 = vadd.f32 %v2849_v43, %v3924_v38  ;;  %v1775_v47 = vpop.f32.mrb[153].mxu0  ;;  %3008 = vmatpush3.bf16.xpose.msk.msra.mxu1 %vm3971_vm3, %v3948_v39 }
 0x301   :  { %v1776_v49 = vadd.f32 %v3924_v38, %v1775_v47 }
 0x302   :  { %v1999_v50 = vmax.f32 %v1781_v45, 0.0 }
 0x303   :  { %v1998_v24 = vmax.f32 %v1776_v49, 0.0 }
 0x305   :  { %v3009_v51 = vpack.c.bf16 %v1999_v50, %v1998_v24 }
 0x307   :  { %v2852_v55 = vpop.f32.mrb[154].mxu0  ;;  %3011 = vmatprep.subr.msk.bf16.mxu1 %vm3971_vm3, %v3009_v51 }
 0x308   :  { %v1791_v57 = vadd.f32 %v2852_v55, %v3924_v38  ;;  %v1785_v59 = vpop.f32.mrb[155].mxu0  ;;  %3014 = vmatpush3.bf16.xpose.msk.msra.mxu1 %vm3971_vm3, %v3953_v54 }
 0x309   :  { %v1786_v60 = vadd.f32 %v3924_v38, %v1785_v59 }
 0x30a   :  { %v2001_v61 = vmax.f32 %v1791_v57, 0.0 }
 0x30b   :  { %v2000_v39 = vmax.f32 %v1786_v60, 0.0 }
 0x30d   :  { %v3015_v62 = vpack.c.bf16 %v2001_v61, %v2000_v39 }
 0x30f   :  { %v2855_v58 = vpop.f32.mrb[156].mxu0  ;;  %3017 = vmatprep.subr.msk.bf16.mxu1 %vm3971_vm3, %v3015_v62 }
 0x310   :  { %v1801_v0 = vadd.f32 %v2855_v58, %v3924_v38  ;;  %v1795_v1 = vpop.f32.mrb[157].mxu0  ;;  %3020 = vmatpush3.bf16.xpose.msk.msra.mxu1 %vm3971_vm3, %v3957_v63 }
 0x311   :  { %v1796_v2 = vadd.f32 %v3924_v38, %v1795_v1 }
 0x312   :  { %v2003_v3 = vmax.f32 %v1801_v0, 0.0 }
 0x313   :  { %v2002_v54 = vmax.f32 %v1796_v2, 0.0 }
 0x315   :  { %v3021_v4 = vpack.c.bf16 %v2003_v3, %v2002_v54 }
 0x317   :  { %v2858_v6 = vpop.f32.mrb[158].mxu0  ;;  %3023 = vmatprep.subr.msk.bf16.mxu1 %vm3971_vm3, %v3021_v4 }
 0x318   :  { %v1811_v7 = vadd.f32 %v2858_v6, %v3924_v38  ;;  %v1805_v10 = vpop.f32.mrb[159].mxu0  ;;  %3026 = vmatpush3.bf16.xpose.msk.msra.mxu1 %vm3971_vm3, %v3961_v5 }
 0x319   :  { %v1806_v11 = vadd.f32 %v3924_v38, %v1805_v10 }
 0x31a   :  { %v2005_v12 = vmax.f32 %v1811_v7, 0.0 }
 0x31b   :  { %v2004_v63 = vmax.f32 %v1806_v11, 0.0 }
 0x31d   :  { %v3027_v13 = vpack.c.bf16 %v2005_v12, %v2004_v63 }
 0x31f   :  { %3029 = vmatprep.subr.msk.bf16.mxu1 %vm3971_vm3, %v3027_v13  ;;  %v2861_v15 = vpop.f32.mrb[160].mxu0 }
 0x320   :  { %3032 = vmatpush3.bf16.xpose.msk.msra.mxu1 %vm3971_vm3, %v3965_v14  ;;  %v1821_v16 = vadd.f32 %v2861_v15, %v3924_v38  ;;  %v1815_v17 = vpop.f32.mrb[161].mxu0  ;;  %v3113_v14 = vmov 0  }
 0x321   :  { %v1816_v18 = vadd.f32 %v3924_v38, %v1815_v17  ;;  %3086 = vset.pattern.permute.xlu0 %v3113_v14 }
 0x322   :  { %v2007_v19 = vmax.f32 %v1821_v16, 0.0  ;;  %2042 = vperm.xlu0 %3086, %v2039_v25  }
 0x323   :  { %v2006_v5 = vmax.f32 %v1816_v18, 0.0 }
 0x325   :  { %v4038_v20 = vpack.c.bf16 %v2007_v19, %v2006_v5 }
 0x327   :  { %v2864_v22 = vpop.f32.mrb[162].mxu0  ;;  %2744 = vmatmul.mubr.msk.f32.vlgmr.msra.gmra.mrb[128].mxu1 %vm2049_vm2, %v3978_v23 }
 0x328   :  { %v1831_v26 = vadd.f32 %v2864_v22, %v3924_v38  ;;  %v1825_v8 = vpop.f32.mrb[163].mxu0  ;;  %2777 = vmatprep.mubr.msk.f32.mxu1 %vm2049_vm2, %v3978_v23 }
 0x329   :  { %v1826_v27 = vadd.f32 %v3924_v38, %v1825_v8 }
 0x32a   :  { %v2009_v28 = vmax.f32 %v1831_v26, 0.0 }
 0x32b   :  { %v2008_v29 = vmax.f32 %v1826_v27, 0.0 }
 0x32d   :  { %v4046_v30 = vpack.c.bf16 %v2009_v28, %v2008_v29 }
 0x32f   :  { %v2867_v31 = vpop.f32.mrb[164].mxu0 }
 0x330   :  { %v1841_v32 = vadd.f32 %v2867_v31, %v3924_v38  ;;  %v1835_v33 = vpop.f32.mrb[165].mxu0 }
 0x331   :  { %v1836_v34 = vadd.f32 %v3924_v38, %v1835_v33 }
 0x332   :  { %v2011_v35 = vmax.f32 %v1841_v32, 0.0 }
 0x333   :  { %v2010_v56 = vmax.f32 %v1836_v34, 0.0 }
 0x335   :  { %v4050_v36 = vpack.c.bf16 %v2011_v35, %v2010_v56 }
 0x337   :  { %v2870_v37 = vpop.f32.mrb[166].mxu0 }
 0x338   :  { %v1851_v40 = vadd.f32 %v2870_v37, %v3924_v38  ;;  %v1845_v52 = vpop.f32.mrb[167].mxu0 }
 0x339   :  { %v1846_v41 = vadd.f32 %v3924_v38, %v1845_v52 }
 0x33a   :  { %v2013_v53 = vmax.f32 %v1851_v40, 0.0 }
 0x33b   :  { %v2012_v9 = vmax.f32 %v1846_v41, 0.0 }
 0x33d   :  { %v4054_v42 = vpack.c.bf16 %v2013_v53, %v2012_v9 }
 0x33f   :  { %v2873_v43 = vpop.f32.mrb[168].mxu0 }
 0x340   :  { %v1861_v45 = vadd.f32 %v2873_v43, %v3924_v38  ;;  %v1855_v47 = vpop.f32.mrb[169].mxu0 }
 0x341   :  { %v1856_v49 = vadd.f32 %v3924_v38, %v1855_v47 }
 0x342   :  { %v2015_v50 = vmax.f32 %v1861_v45, 0.0 }
 0x343   :  { %v2014_v24 = vmax.f32 %v1856_v49, 0.0 }
 0x345   :  { %v4058_v51 = vpack.c.bf16 %v2015_v50, %v2014_v24 }
 0x347   :  { %v2876_v55 = vpop.f32.mrb[170].mxu0 }
 0x348   :  { %v1871_v57 = vadd.f32 %v2876_v55, %v3924_v38  ;;  %v1865_v59 = vpop.f32.mrb[171].mxu0 }
 0x349   :  { %v1866_v60 = vadd.f32 %v3924_v38, %v1865_v59 }
 0x34a   :  { %v2017_v61 = vmax.f32 %v1871_v57, 0.0 }
 0x34b   :  { %v2016_v39 = vmax.f32 %v1866_v60, 0.0 }
 0x34d   :  { %v4062_v62 = vpack.c.bf16 %v2017_v61, %v2016_v39 }
 0x34f   :  { %v2879_v58 = vpop.f32.mrb[172].mxu0 }
 0x350   :  { %v1881_v0 = vadd.f32 %v2879_v58, %v3924_v38  ;;  %v1875_v1 = vpop.f32.mrb[173].mxu0 }
 0x351   :  { %v1876_v2 = vadd.f32 %v3924_v38, %v1875_v1 }
 0x352   :  { %v2019_v3 = vmax.f32 %v1881_v0, 0.0 }
 0x353   :  { %v2018_v54 = vmax.f32 %v1876_v2, 0.0 }
 0x355   :  { %v4066_v4 = vpack.c.bf16 %v2019_v3, %v2018_v54 }
 0x357   :  { %v2882_v6 = vpop.f32.mrb[174].mxu0 }
 0x358   :  { %v1891_v7 = vadd.f32 %v2882_v6, %v3924_v38  ;;  %v1885_v10 = vpop.f32.mrb[175].mxu0 }
 0x359   :  { %v1886_v11 = vadd.f32 %v3924_v38, %v1885_v10 }
 0x35a   :  { %v2021_v12 = vmax.f32 %v1891_v7, 0.0 }
 0x35b   :  { %v2020_v63 = vmax.f32 %v1886_v11, 0.0 }
 0x35d   :  { %v4070_v13 = vpack.c.bf16 %v2021_v12, %v2020_v63 }
 0x35f   :  { %v2885_v15 = vpop.f32.mrb[176].mxu0 }
 0x360   :  { %v1901_v16 = vadd.f32 %v2885_v15, %v3924_v38  ;;  %v1895_v17 = vpop.f32.mrb[177].mxu0 }
 0x361   :  { %v1896_v18 = vadd.f32 %v3924_v38, %v1895_v17 }
 0x362   :  { %v2023_v19 = vmax.f32 %v1901_v16, 0.0 }
 0x363   :  { %v2022_v5 = vmax.f32 %v1896_v18, 0.0 }
 0x365   :  { %v3033_v22 = vpack.c.bf16 %v2023_v19, %v2022_v5  ;;  %v3114_v5 = vmov 1966171168  }
 0x367   :  { %v2888_v25 = vpop.f32.mrb[178].mxu0  ;;  %3035 = vmatprep.subr.msk.bf16.mxu1 %vm3971_vm3, %v3033_v22  ;;  %v2394_v22 = vunpack.c.l.s4 %v3114_v5 }
 0x368   :  { %v1911_v26 = vadd.f32 %v2888_v25, %v3924_v38  ;;  %v1905_v8 = vpop.f32.mrb[179].mxu0  ;;  %3038 = vmatpush3.bf16.xpose.msk.msra.mxu1 %vm3971_vm3, %v4038_v20 }
 0x369   :  { %v1906_v14 = vadd.f32 %v3924_v38, %v1905_v8  ;;  %v2395_v25 = vunpack.c.0.s8 %v2394_v22 }
 0x36a   :  { %v2025_v27 = vmax.f32 %v1911_v26, 0.0 }
 0x36b   :  { %v2024_v28 = vmax.f32 %v1906_v14, 0.0  ;;  %v2398_v21 = vsub.s32 %v2395_v25, %v3542_v46 }
 0x36d   :  { %v3039_v29 = vpack.c.bf16 %v2025_v27, %v2024_v28 }
 0x36f   :  { %v2891_v31 = vpop.f32.mrb[180].mxu0  ;;  %3041 = vmatprep.subr.msk.bf16.mxu1 %vm3971_vm3, %v3039_v29 }
 0x370   :  { %v1921_v32 = vadd.f32 %v2891_v31, %v3924_v38  ;;  %v1915_v33 = vpop.f32.mrb[181].mxu0  ;;  %3044 = vmatpush3.bf16.xpose.msk.msra.mxu1 %vm3971_vm3, %v4046_v30 }
 0x371   :  { %v1916_v34 = vadd.f32 %v3924_v38, %v1915_v33 }
 0x372   :  { %v2027_v35 = vmax.f32 %v1921_v32, 0.0 }
 0x373   :  { %v2026_v20 = vmax.f32 %v1916_v34, 0.0 }
 0x375   :  { %v3045_v56 = vpack.c.bf16 %v2027_v35, %v2026_v20 }
 0x377   :  { %v2894_v37 = vpop.f32.mrb[182].mxu0  ;;  %3047 = vmatprep.subr.msk.bf16.mxu1 %vm3971_vm3, %v3045_v56 }
 0x378   :  { %v1931_v40 = vadd.f32 %v2894_v37, %v3924_v38  ;;  %v1925_v52 = vpop.f32.mrb[183].mxu0  ;;  %3050 = vmatpush3.bf16.xpose.msk.msra.mxu1 %vm3971_vm3, %v4050_v36 }
 0x379   :  { %v1926_v41 = vadd.f32 %v3924_v38, %v1925_v52 }
 0x37a   :  { %v2029_v53 = vmax.f32 %v1931_v40, 0.0 }
 0x37b   :  { %v2028_v30 = vmax.f32 %v1926_v41, 0.0 }
 0x37d   :  { %v3051_v9 = vpack.c.bf16 %v2029_v53, %v2028_v30 }
 0x37f   :  { %v2897_v43 = vpop.f32.mrb[184].mxu0  ;;  %3053 = vmatprep.subr.msk.bf16.mxu1 %vm3971_vm3, %v3051_v9 }
 0x380   :  { %v1941_v45 = vadd.f32 %v2897_v43, %v3924_v38  ;;  %v1935_v47 = vpop.f32.mrb[185].mxu0  ;;  %3056 = vmatpush3.bf16.xpose.msk.msra.mxu1 %vm3971_vm3, %v4054_v42 }
 0x381   :  { %v1936_v49 = vadd.f32 %v3924_v38, %v1935_v47 }
 0x382   :  { %v2031_v50 = vmax.f32 %v1941_v45, 0.0 }
 0x383   :  { %v2030_v36 = vmax.f32 %v1936_v49, 0.0 }
 0x385   :  { %v3057_v24 = vpack.c.bf16 %v2031_v50, %v2030_v36 }
 0x387   :  { %v2900_v55 = vpop.f32.mrb[186].mxu0  ;;  %3059 = vmatprep.subr.msk.bf16.mxu1 %vm3971_vm3, %v3057_v24 }
 0x388   :  { %v1951_v57 = vadd.f32 %v2900_v55, %v3924_v38  ;;  %v1945_v59 = vpop.f32.mrb[187].mxu0  ;;  %3062 = vmatpush3.bf16.xpose.msk.msra.mxu1 %vm3971_vm3, %v4058_v51 }
 0x389   :  { %v1946_v60 = vadd.f32 %v3924_v38, %v1945_v59 }
 0x38a   :  { %v2033_v61 = vmax.f32 %v1951_v57, 0.0 }
 0x38b   :  { %v2032_v42 = vmax.f32 %v1946_v60, 0.0 }
 0x38d   :  { %v3063_v39 = vpack.c.bf16 %v2033_v61, %v2032_v42 }
 0x38f   :  { %v2903_v58 = vpop.f32.mrb[188].mxu0  ;;  %3065 = vmatprep.subr.msk.bf16.mxu1 %vm3971_vm3, %v3063_v39 }
 0x390   :  { %v1961_v0 = vadd.f32 %v2903_v58, %v3924_v38  ;;  %v1955_v1 = vpop.f32.mrb[189].mxu0  ;;  %3068 = vmatpush3.bf16.xpose.msk.msra.mxu1 %vm3971_vm3, %v4062_v62 }
 0x391   :  { %v1956_v2 = vadd.f32 %v3924_v38, %v1955_v1 }
 0x392   :  { %v2035_v3 = vmax.f32 %v1961_v0, 0.0 }
 0x393   :  { %v2034_v51 = vmax.f32 %v1956_v2, 0.0 }
 0x395   :  { %v3069_v54 = vpack.c.bf16 %v2035_v3, %v2034_v51 }
 0x397   :  { %v2906_v6 = vpop.f32.mrb[190].mxu0  ;;  %3071 = vmatprep.subr.msk.bf16.mxu1 %vm3971_vm3, %v3069_v54 }
 0x398   :  { %v1971_v7 = vadd.f32 %v2906_v6, %v3924_v38  ;;  %v1965_v10 = vpop.f32.mrb[191].mxu0  ;;  %3074 = vmatpush3.bf16.xpose.msk.msra.mxu1 %vm3971_vm3, %v4066_v4 }
 0x399   :  { %v1966_v11 = vadd.f32 %v3924_v38, %v1965_v10 }
 0x39a   :  { %v2037_v12 = vmax.f32 %v1971_v7, 0.0 }
 0x39b   :  { %v2036_v62 = vmax.f32 %v1966_v11, 0.0 }
 0x39d   :  { %v3075_v63 = vpack.c.bf16 %v2037_v12, %v2036_v62 }
 0x39f   :  { %3077 = vmatprep.subr.msk.bf16.mxu1 %vm3971_vm3, %v3075_v63 }
 0x3a0   :  { %3080 = vmatpush3.bf16.xpose.msk.msra.mxu1 %vm3971_vm3, %v4070_v13 }
 0x3a1   :  { %v2043_v15 = vpop.permute.xlu0 %2042 }
 0x3a2   :  { %v2048_v16 = vrot.slane %v2043_v15, %v119_v48 }
 0x3a7   :  { %2778 = vmatmul.mubr.msk.f32.vlgmr.msra.gmra.mrb[130].mxu1 %vm2049_vm2, %v3978_v23 }
 0x3fa   :  { %v2311_v4 = vpop.f32.mrb[128].mxu1 }
 0x3fb   :  { %v2312_v17 = vadd.f32 %v2311_v4, %v2048_v16  ;;  %v2313_v38 = vpop.f32.mrb[129].mxu1 }
 0x3fc   :  { %v2314_v18 = vadd.f32 %v2313_v38, %v2048_v16 }
 0x3fe   :  { %v2391_v19 = vcombine.low %v2312_v17, %v2314_v18 }
 0x400   :  { %v2399_v23 = vrot.slane %v2391_v19, %v2398_v21 }
 0x47a   :  { %v2382_v26 = vpop.f32.mrb[130].mxu1 }
 0x47b   :  { %v2383_v8 = vadd.f32 %v2382_v26, %v2048_v16  ;;  %v2384_v14 = vpop.f32.mrb[131].mxu1 }
 0x47c   :  { %v2385_v13 = vadd.f32 %v2384_v14, %v2048_v16 }
 0x47e   :  { %v2392_v27 = vcombine.low %v2383_v8, %v2385_v13 }
 0x480   :  { %v2406_v28 = vrot.slane %v2392_v27, %v2398_v21 }
 0x482   :  { %v2407_v48 = vcombine.low %v2399_v23, %v2406_v28 }
 0x484   :  { %v2414_v29 = vrot.slane %v2407_v48, %v2398_v21 }
 0x486   :  { %2420 = vst.msk [vmem:[#allocation3] sm:$0xf] %vm2418_vm4, %v2414_v29 }
 0x487   :  { %3098 = shalt.err (!%p3095_p4)
}
 0x488   :  { %s3099_s14 = scalar_lea.hbm %s4155_s9, 64 }
 0x489   :  { %p3100_p5 = scmp.ne.s32.totalorder %s4155_s9, %s3099_s14  ;;  %p3103_p6 = scmp.lt.u32.totalorder %s3099_s14, %s4155_s9 }
 0x48b   :  { %p3105_p7 = pnand %p3103_p6, %p3100_p5 }
 0x48d   :  { %3108 = shalt.err (!%p3105_p7)
}
 0x48e   :  { %2430 = dma.vmem_to_hbm [thread:$0]  %s2428_s10, 64, %s4155_s9, [#allocation4]  }
 0x48f   :  { %3109 = dma.done.wait [#allocation4], 64  }
 0x490   :  { %3110 = vsyncadd [#allocation4], 4294967232 }
 0x491   :  { %2434 = vsyncpa [#allocation4], 1 }

</bundles_post_ra>
